<compile_context>
chip_gen: v7x
topology: tpu7x:2x2x1
jax: 0.10.0
libtpu: 0.0.40
codegen_flags: <defaults>
</compile_context>

<pallas_src>
import functools

import jax
import jax.numpy as jnp
from jax.experimental import pallas as pl
from jax.experimental.pallas import tpu as pltpu

NEG_SLOPE = 0.1  # DimensionSpecificModel default negative_slope=0.1 (not 0.01)


def _leaky_relu(v):
    return jnp.where(v >= 0, v, NEG_SLOPE * v)


# ------------- fused feature_net + (attention-folded) dim_specific_net -------------
def fused_kernel(x_ref, w1t_ref, b1_ref, w2e_ref, b2e_ref, out_ref):
    # feature_net: Linear + LeakyReLU on a (tn, Fx) tile. W1 pre-transposed in
    # the wrapper -> no in-kernel .T / relayout.
    fea = jnp.dot(x_ref[...], w1t_ref[...],
                  preferred_element_type=jnp.float32) + b1_ref[...]
    fea = _leaky_relu(fea)                                        # (tn, H) f32

    # dim_specific_net through the attention-folded weight:
    #   out[n, m*O + o] = leaky_relu(sum_h fea[n,h] * atten[m,h] * W2[o,h] + b2[o])
    out = jnp.dot(fea.astype(w2e_ref.dtype), w2e_ref[...],
                  preferred_element_type=jnp.float32) + b2e_ref[...]
    out_ref[...] = _leaky_relu(out).astype(out_ref.dtype)         # (tn, M*O) lane-dense


def _invariant_spec(shape):
    """Grid-invariant operand: constant index_map (fetched once). Single-buffer
    it to halve its VMEM footprint (matters at production H / M*O sizes);
    silently fall back on jax versions without pipeline_mode support."""
    index_map = lambda i: (0,) * len(shape)
    try:
        return pl.BlockSpec(shape, index_map, pipeline_mode=pl.Buffered(1))
    except (TypeError, ValueError):
        return pl.BlockSpec(shape, index_map)


def _pick_tile(n, max_tn=1024):
    """Largest 8-aligned tile <= max_tn that divides n and keeps grid >= 2
    (v7x megacore).  Returns (tile, pad); pad > 0 only if no aligned divisor
    exists (avoids the jnp.pad HBM copy in the common case)."""
    if n <= 8:
        return n, 0
    upper = min(max_tn, n // 2) if n >= 16 else n
    t = max((upper // 8) * 8, 8)
    while t >= 8:
        if n % t == 0:
            return t, 0
        t -= 8
    # no aligned divisor: minimal padding to an 8-aligned half-split
    t = min(max_tn, -(-((n + 1) // 2) // 8) * 8)
    return t, (-n) % t


@functools.partial(jax.jit, static_argnames=("tn", "compute_dtype", "out_dtype"))
def dimension_specific_forward(x, y, params, *, tn=None,
                               compute_dtype=jnp.float32,
                               out_dtype=jnp.float32):
    """Forward pass of DimensionSpecificModel. Returns (atten, specific_fea)."""
    w1, b1 = params["w1"], params["b1"]          # (H, Fx), (1, H)
    wa, ba = params["wa"], params["ba"]          # (H, Fy), (1, H)
    w2, b2 = params["w2"], params["b2"]          # (O, H), (1, O)

    N, Fx = x.shape
    M = y.shape[0]
    H = w1.shape[0]
    O = w2.shape[0]

    # --- attention branch: tiny (M,Fy)@(Fy,H) + sigmoid, grid-invariant,
    #     fused into the same jit as the kernel (single launch region) ---
    atten = jax.nn.sigmoid(y @ wa.T + ba).astype(jnp.float32)     # (M, H)

    # --- fold attention + W2 into a lane-dense effective second-layer weight ---
    # (valid only because batchNorm=False and dropout=False in this module)
    w2_eff = jnp.einsum("mh,oh->hmo", atten, w2).reshape(H, M * O)           # (H, M*O)
    b2_eff = jnp.broadcast_to(b2.reshape(1, 1, O), (1, M, O)).reshape(1, M * O)

    # --- pre-transpose W1 once; MXU operand dtype (bf16 valid on v5e/v6e/v7x) ---
    # NOTE: in the bf16 path atten*W2 is folded in f32 then cast once; rounding
    # differs slightly from casting atten and W2 separately (documented).
    w1t_mm = w1.T.astype(compute_dtype)                           # (Fx, H)
    x_mm = x.astype(compute_dtype)
    w2e_mm = w2_eff.astype(compute_dtype)
    b1_f32 = b1.astype(jnp.float32)
    b2e_f32 = b2_eff.astype(jnp.float32)

    # --- tile N: aligned divisor of N (no pad copy), grid >= 2 when possible ---
    if tn is None:
        tn, n_pad = _pick_tile(N)
    else:
        tn = min(tn, N)
        n_pad = (-N) % tn
    if n_pad:  # rare fallback; padded rows are computed then sliced off
        x_mm = jnp.pad(x_mm, ((0, n_pad), (0, 0)))
    Np = N + n_pad
    grid = Np // tn

    in_b = jnp.dtype(compute_dtype).itemsize
    out_b = jnp.dtype(out_dtype).itemsize
    cost = pl.CostEstimate(
        flops=2 * Np * (Fx * H + H * M * O),
        transcendentals=0,
        bytes_accessed=(Np * Fx * in_b + Fx * H * in_b + H * 4
                        + H * M * O * in_b + M * O * 4 + Np * M * O * out_b),
    )

    out_flat = pl.pallas_call(
        fused_kernel,
        out_shape=jax.ShapeDtypeStruct((Np, M * O), out_dtype),
        grid_spec=pltpu.PrefetchScalarGridSpec(
            num_scalar_prefetch=0,
            grid=(grid,),
            in_specs=[
                pl.BlockSpec((tn, Fx), lambda i: (i, 0)),      # x tile (double-buffered)
                _invariant_spec((Fx, H)),                      # W1.T   (single-buffered)
                _invariant_spec((1, H)),                       # b1
                _invariant_spec((H, M * O)),                   # W2_eff (atten-folded)
                _invariant_spec((1, M * O)),                   # b2_eff
            ],
            out_specs=pl.BlockSpec((tn, M * O), lambda i: (i, 0)),
        ),
        compiler_params=pltpu.CompilerParams(
            dimension_semantics=("parallel",),                 # shards steps on v7x's 2 TCs
            vmem_limit_bytes=32 * 1024 * 1024,
        ),
        cost_estimate=cost,
    )(x_mm, w1t_mm, b1_f32, w2e_mm, b2e_f32)

    specific_fea = out_flat[:N].reshape(N, M, O)   # wrapper reshape = free metadata
    return atten, specific_fea


# ---------------- deterministic parameter init (PyTorch conventions) ----------------
def init_params(key, in_features_x, in_features_y, num_hiddens, output_size):
    def xavier(k, out_f, in_f):
        bound = (6.0 / (in_f + out_f)) ** 0.5
        return jax.random.uniform(k, (out_f, in_f), jnp.float32, -bound, bound)

    def bias(k, in_f, out_f):
        bound = 1.0 / (in_f ** 0.5)
        return jax.random.uniform(k, (1, out_f), jnp.float32, -bound, bound)

    ks = jax.random.split(key, 6)
    return {
        "w1": xavier(ks[0], num_hiddens, in_features_x),
        "b1": bias(ks[1], in_features_x, num_hiddens),
        "wa": xavier(ks[2], num_hiddens, in_features_y),
        "ba": bias(ks[3], in_features_y, num_hiddens),
        "w2": xavier(ks[4], output_size, num_hiddens),
        "b2": bias(ks[5], num_hiddens, output_size),
    }


# ---------------- pure-JAX reference for verification ----------------
def reference_forward(x, y, p):
    fea = _leaky_relu(x @ p["w1"].T + p["b1"])
    atten = jax.nn.sigmoid(y @ p["wa"].T + p["ba"])
    spec = fea[:, None, :] * atten[None, :, :]
    out = _leaky_relu(spec @ p["w2"].T + p["b2"])
    return atten, out


if __name__ == "__main__":
    # Small shapes consistent with the module; M*O = 128 -> lane-dense output.
    in_features_x, in_features_y = 16, 8
    num_hiddens, output_size = 32, 16
    N, M = 1024, 8   # x batch (auto tile tn=512, grid=2), y batch

    key = jax.random.PRNGKey(0)
    kx, ky, kp = jax.random.split(key, 3)
    x = jax.random.normal(kx, (N, in_features_x), jnp.float32)
    y = jax.random.normal(ky, (M, in_features_y), jnp.float32)
    params = init_params(kp, in_features_x, in_features_y, num_hiddens, output_size)

    atten_ref, spec_ref = reference_forward(x, y, params)

    # f32 path: verifies semantics tightly (auto tile: tn=512, grid=2, no pad).
    atten, specific_fea = dimension_specific_forward(x, y, params)
    jax.block_until_ready((atten, specific_fea))
    assert atten.shape == (M, num_hiddens)
    assert specific_fea.shape == (N, M, output_size)
    assert jnp.allclose(atten, atten_ref, atol=1e-5, rtol=1e-5)
    assert jnp.allclose(specific_fea, spec_ref, atol=1e-4, rtol=1e-4)

    # bf16 MXU operands + bf16 output store (valid on v5e/v6e/v7x); f32
    # accumulation and f32 leaky_relu epilogue retained -> looser tolerance.
    _, spec_bf16 = dimension_specific_forward(
        x, y, params, compute_dtype=jnp.bfloat16, out_dtype=jnp.bfloat16)
    jax.block_until_ready(spec_bf16)
    assert spec_bf16.dtype == jnp.bfloat16
    assert jnp.allclose(spec_bf16.astype(jnp.float32), spec_ref,
                        atol=1e-1, rtol=1e-1)

    # TODO(synk): batchNorm/dropout branches of MLP (disabled by module
    # defaults) are not implemented; the attention fold assumes them off.
    print("KERNEL_OK")
</pallas_src>

<mosaic_0001>
module attributes {stable_mosaic.version = 11 : i64} {
  func.func @fused_kernel(%arg0: i32, %arg1: memref<512x16xf32, #tpu.memory_space<vmem>>, %arg2: memref<16x32xf32, #tpu.memory_space<vmem>>, %arg3: memref<1x32xf32, #tpu.memory_space<vmem>>, %arg4: memref<32x128xf32, #tpu.memory_space<vmem>>, %arg5: memref<1x128xf32, #tpu.memory_space<vmem>>, %arg6: memref<512x128xf32, #tpu.memory_space<vmem>>) attributes {dimension_semantics = [#tpu.dimension_semantics<parallel>], iteration_bounds = array<i64: 2>, scalar_prefetch = 0 : i64, scratch_operands = 0 : i64, tpu.core_type = #tpu.core_type<tc>, window_params = [{transform_indices = @transform_0, window_bounds = array<i64: 512, 16>}, {pipeline_mode = #tpu.pipeline_mode<synchronous>, transform_indices = @transform_1, window_bounds = array<i64: 16, 32>}, {pipeline_mode = #tpu.pipeline_mode<synchronous>, transform_indices = @transform_2, window_bounds = array<i64: 1, 32>}, {pipeline_mode = #tpu.pipeline_mode<synchronous>, transform_indices = @transform_3, window_bounds = array<i64: 32, 128>}, {pipeline_mode = #tpu.pipeline_mode<synchronous>, transform_indices = @transform_4, window_bounds = array<i64: 1, 128>}, {transform_indices = @transform_5, window_bounds = array<i64: 512, 128>}]} {
    %c0 = arith.constant 0 : index
    %c0_0 = arith.constant 0 : index
    %0 = vector.load %arg1[%c0, %c0_0] : memref<512x16xf32, #tpu.memory_space<vmem>>, vector<512x16xf32>
    %c0_1 = arith.constant 0 : index
    %c0_2 = arith.constant 0 : index
    %1 = vector.load %arg2[%c0_1, %c0_2] : memref<16x32xf32, #tpu.memory_space<vmem>>, vector<16x32xf32>
    %cst = arith.constant dense<0.000000e+00> : vector<512x32xf32>
    %2 = tpu.matmul %0, %1, %cst {dimension_numbers = #tpu.dot_dimension_numbers<[1], [0], [0], [1], [0, 0, 1, 1], [], []>} : vector<512x16xf32>, vector<16x32xf32>, vector<512x32xf32> -> vector<512x32xf32>
    %c0_3 = arith.constant 0 : index
    %c0_4 = arith.constant 0 : index
    %3 = vector.load %arg3[%c0_3, %c0_4] : memref<1x32xf32, #tpu.memory_space<vmem>>, vector<1x32xf32>
    %4 = vector.broadcast %3 : vector<1x32xf32> to vector<512x32xf32>
    %5 = arith.addf %2, %4 : vector<512x32xf32>
    %cst_5 = arith.constant 0.000000e+00 : f32
    %6 = vector.broadcast %cst_5 : f32 to vector<512x32xf32>
    %7 = arith.cmpf oge, %5, %6 : vector<512x32xf32>
    %cst_6 = arith.constant 1.000000e-01 : f32
    %8 = vector.broadcast %cst_6 : f32 to vector<512x32xf32>
    %9 = arith.mulf %8, %5 : vector<512x32xf32>
    %10 = arith.select %7, %5, %9 : vector<512x32xi1>, vector<512x32xf32>
    %c0_7 = arith.constant 0 : index
    %c0_8 = arith.constant 0 : index
    %11 = vector.load %arg4[%c0_7, %c0_8] : memref<32x128xf32, #tpu.memory_space<vmem>>, vector<32x128xf32>
    %cst_9 = arith.constant dense<0.000000e+00> : vector<512x128xf32>
    %12 = tpu.matmul %10, %11, %cst_9 {dimension_numbers = #tpu.dot_dimension_numbers<[1], [0], [0], [1], [0, 0, 1, 1], [], []>} : vector<512x32xf32>, vector<32x128xf32>, vector<512x128xf32> -> vector<512x128xf32>
    %c0_10 = arith.constant 0 : index
    %c0_11 = arith.constant 0 : index
    %13 = vector.load %arg5[%c0_10, %c0_11] : memref<1x128xf32, #tpu.memory_space<vmem>>, vector<1x128xf32>
    %14 = vector.broadcast %13 : vector<1x128xf32> to vector<512x128xf32>
    %15 = arith.addf %12, %14 : vector<512x128xf32>
    %cst_12 = arith.constant 0.000000e+00 : f32
    %16 = vector.broadcast %cst_12 : f32 to vector<512x128xf32>
    %17 = arith.cmpf oge, %15, %16 : vector<512x128xf32>
    %cst_13 = arith.constant 1.000000e-01 : f32
    %18 = vector.broadcast %cst_13 : f32 to vector<512x128xf32>
    %19 = arith.mulf %18, %15 : vector<512x128xf32>
    %20 = arith.select %17, %15, %19 : vector<512x128xi1>, vector<512x128xf32>
    %c0_14 = arith.constant 0 : index
    %c0_15 = arith.constant 0 : index
    %21 = vector.load %arg6[%c0_14, %c0_15] : memref<512x128xf32, #tpu.memory_space<vmem>>, vector<512x128xf32>
    tpu.vector_store %arg6[%c0_14, %c0_15], %20 {strides = array<i32>} : memref<512x128xf32, #tpu.memory_space<vmem>>, vector<512x128xf32>,
    return
  }
  func.func @transform_0(%arg0: i32) -> (i32, i32) {
    %c0_i32 = arith.constant 0 : i32
    %c0_i32_0 = arith.constant 0 : i32
    return %arg0, %c0_i32 : i32, i32
  }
  func.func @transform_1(%arg0: i32) -> (i32, i32) {
    %c0_i32 = arith.constant 0 : i32
    %c0_i32_0 = arith.constant 0 : i32
    %c0_i32_1 = arith.constant 0 : i32
    return %c0_i32, %c0_i32_0 : i32, i32
  }
  func.func @transform_2(%arg0: i32) -> (i32, i32) {
    %c0_i32 = arith.constant 0 : i32
    %c0_i32_0 = arith.constant 0 : i32
    %c0_i32_1 = arith.constant 0 : i32
    return %c0_i32, %c0_i32_0 : i32, i32
  }
  func.func @transform_3(%arg0: i32) -> (i32, i32) {
    %c0_i32 = arith.constant 0 : i32
    %c0_i32_0 = arith.constant 0 : i32
    %c0_i32_1 = arith.constant 0 : i32
    return %c0_i32, %c0_i32_0 : i32, i32
  }
  func.func @transform_4(%arg0: i32) -> (i32, i32) {
    %c0_i32 = arith.constant 0 : i32
    %c0_i32_0 = arith.constant 0 : i32
    %c0_i32_1 = arith.constant 0 : i32
    return %c0_i32, %c0_i32_0 : i32, i32
  }
  func.func @transform_5(%arg0: i32) -> (i32, i32) {
    %c0_i32 = arith.constant 0 : i32
    %c0_i32_0 = arith.constant 0 : i32
    return %arg0, %c0_i32 : i32, i32
  }
}

</mosaic_0001>

<bundles_post_ra>
// kernel: dimension_specific_forward.1
= control target key start
LH: loop header
LB: loop body
LE: loop exit
PB: predicated region body
PF: predicated region fallthrough
CT: control target
= control target key end

     0   :  { %s2509_s18 = smov 0   ;;  %s2949_s0 = inlined_call_operand.vmem [shape: f32[1024,16], index: 0, kind: input, shape index: {}]   ;;  %s2950_s1 = inlined_call_operand.vmem [shape: f32[16,32], index: 1, kind: input, shape index: {}]   ;;  %s2951_s2 = inlined_call_operand.vmem [shape: f32[1,32], index: 2, kind: input, shape index: {}]   ;;  %s2952_s3 = inlined_call_operand.vmem [shape: f32[32,128], index: 3, kind: input, shape index: {}]   ;;  %s2953_s4 = inlined_call_operand.vmem [shape: f32[1,128], index: 4, kind: input, shape index: {}]   ;;  %s2954_s5 = inlined_call_operand.vmem [shape: f32[1024,128], index: 5, kind: output, shape index: {}]  }
   0x1 LB: > { %s1972_s19 = sadd.s32 4294967295, %s2477_s18   ;;  %p1976_p0 = scmp.ge.s32.totalorder %s2477_s18, 1  ;;  %s2477_s18 = sphi %s2509_s18, %s15_s18  }
   0x2   : > { %p188_p1 = scmp.lt.s32.totalorder %s2477_s18, 3 }
   0x4   : > { %p189_p2 = pnand %p1976_p0, %p188_p1 }
   0x5   : > { %v292_v0 = vld [vmem:[%s2950_s1] sm:$0xff] (!%p189_p2)  ;;  %v293_v1 = vld [vmem:[%s2950_s1 + $0x8] sm:$0xff] (!%p189_p2)  ;;  %s1977_s24 = sshll.u32 (!%p189_p2), %s1972_s19, 6  ;;  %vm301_vm0 = vcmask (!%p189_p2), 130048   ;;  %v1073_v51 = vld [vmem:[%s2952_s3 + $0x10] sm:$0xff] (!%p189_p2)  ;;  %vm1082_vm3 = vcmask (!%p189_p2), 261120  }
   0x6   : > { %192 = sbr.rel (%p189_p2) target bundleno = 580 (0x244), region = 40  ;;  %v2451_v2 = vpack.c.bf16 (!%p189_p2), %v293_v1, %v292_v0  ;;  %p217_p3 = scmp.lt.s32.totalorder (!%p189_p2), %s1977_s24, 127  ;;  %v1071_v46 = vld [vmem:[%s2952_s3] sm:$0xff] (!%p189_p2)  ;;  %v1072_v47 = vld [vmem:[%s2952_s3 + $0x8] sm:$0xff] (!%p189_p2)  ;;  %v1074_v52 = vld [vmem:[%s2952_s3 + $0x18] sm:$0xff] (!%p189_p2) }
   0x7   : > { %v2455_v49 = vpack.c.bf16 (!%p189_p2), %v1072_v47, %v1071_v46  ;;  %v2459_v54 = vpack.c.bf16 (!%p189_p2), %v1074_v52, %v1073_v51 }
   0x8   : > { %2452 = vmatprep.subr.bf16.mxu0 (!%p189_p2), %v2451_v2 }
   0x9   : > { %2454 = vmatpush3.bf16.msra.mxu0 (!%p189_p2), %v2451_v2  ;;  %2456 = vmatprep.subr.bf16.mxu1 (!%p189_p2), %v2455_v49 }
   0xa   : > { %2458 = vmatpush3.bf16.msra.mxu1 (!%p189_p2), %v2455_v49 }
   0xb   : > { %2460 = vmatprep.subr.bf16.mxu1 (!%p189_p2), %v2459_v54 }
   0xd   : > { %s2956_s24 = smov (!%p217_p3, %s1977_s24), 127 }
   0xe   : > { %s1978_s25 = sshll.u32 %s2956_s24, 3  ;;  %2462 = vmatpush3.bf16.msra.mxu1 %v2459_v54 }
   0xf   : > { %s2531_s28 = scalar_lea.vmem %s2949_s0, %s1978_s25  ;;  %s2818_s19 = scalar_lea.vmem %s2954_s5, %s1978_s25 }
  0x10   : > { %v228_v3 = vld [vmem:[%s2531_s28] sm:$0xff]  ;;  %v229_v4 = vld [vmem:[%s2531_s28 + $0x8] sm:$0xff]  ;;  %v230_v5 = vld [vmem:[%s2531_s28 + $0x10] sm:$0xff] }
  0x11   : > { %2251 = vmatprep.mubr.msk.f32.mxu0 %vm301_vm0, %v228_v3  ;;  %v231_v6 = vld [vmem:[%s2531_s28 + $0x18] sm:$0xff]  ;;  %v232_v7 = vld [vmem:[%s2531_s28 + $0x20] sm:$0xff]  ;;  %v233_v8 = vld [vmem:[%s2531_s28 + $0x28] sm:$0xff] }
  0x12   : > { %2252 = vmatmul.mubr.msk.f32.vlgmr.msra.gmra.mrb[0].mxu0 %vm301_vm0, %v229_v4  ;;  %v234_v9 = vld [vmem:[%s2531_s28 + $0x30] sm:$0xff]  ;;  %v235_v10 = vld [vmem:[%s2531_s28 + $0x38] sm:$0xff]  ;;  %v236_v11 = vld [vmem:[%s2531_s28 + $0x40] sm:$0xff] }
  0x13   : > { %2254 = vmatprep.mubr.msk.f32.mxu0 %vm301_vm0, %v230_v5  ;;  %v237_v12 = vld [vmem:[%s2531_s28 + $0x48] sm:$0xff]  ;;  %v238_v13 = vld [vmem:[%s2531_s28 + $0x50] sm:$0xff]  ;;  %v239_v14 = vld [vmem:[%s2531_s28 + $0x58] sm:$0xff] }
  0x14   : > { %v240_v15 = vld [vmem:[%s2531_s28 + $0x60] sm:$0xff]  ;;  %v241_v16 = vld [vmem:[%s2531_s28 + $0x68] sm:$0xff]  ;;  %v242_v17 = vld [vmem:[%s2531_s28 + $0x70] sm:$0xff] }
  0x15   : > { %v243_v18 = vld [vmem:[%s2531_s28 + $0x78] sm:$0xff]  ;;  %v244_v19 = vld [vmem:[%s2531_s28 + $0x80] sm:$0xff]  ;;  %v245_v20 = vld [vmem:[%s2531_s28 + $0x88] sm:$0xff] }
  0x16   : > { %2255 = vmatmul.mubr.msk.f32.gmra.mrb[2].mxu0 %vm301_vm0, %v231_v6  ;;  %v246_v21 = vld [vmem:[%s2531_s28 + $0x90] sm:$0xff]  ;;  %v247_v22 = vld [vmem:[%s2531_s28 + $0x98] sm:$0xff]  ;;  %v248_v23 = vld [vmem:[%s2531_s28 + $0xa0] sm:$0xff] }
  0x17   : > { %2257 = vmatprep.mubr.msk.f32.mxu0 %vm301_vm0, %v232_v7  ;;  %v249_v24 = vld [vmem:[%s2531_s28 + $0xa8] sm:$0xff]  ;;  %v250_v25 = vld [vmem:[%s2531_s28 + $0xb0] sm:$0xff]  ;;  %v251_v26 = vld [vmem:[%s2531_s28 + $0xb8] sm:$0xff] }
  0x18   : > { %v252_v27 = vld [vmem:[%s2531_s28 + $0xc0] sm:$0xff]  ;;  %v253_v28 = vld [vmem:[%s2531_s28 + $0xc8] sm:$0xff]  ;;  %v254_v29 = vld [vmem:[%s2531_s28 + $0xd0] sm:$0xff] }
  0x19   : > { %v255_v30 = vld [vmem:[%s2531_s28 + $0xd8] sm:$0xff]  ;;  %v256_v31 = vld [vmem:[%s2531_s28 + $0xe0] sm:$0xff]  ;;  %v257_v32 = vld [vmem:[%s2531_s28 + $0xe8] sm:$0xff] }
  0x1a   : > { %2258 = vmatmul.mubr.msk.f32.gmra.mrb[4].mxu0 %vm301_vm0, %v233_v8  ;;  %v258_v33 = vld [vmem:[%s2531_s28 + $0xf0] sm:$0xff]  ;;  %v259_v34 = vld [vmem:[%s2531_s28 + $0xf8] sm:$0xff]  ;;  %v260_v35 = vld [vmem:[%s2531_s28 + $0x100] sm:$0xff] }
  0x1b   : > { %2260 = vmatprep.mubr.msk.f32.mxu0 %vm301_vm0, %v234_v9  ;;  %v261_v36 = vld [vmem:[%s2531_s28 + $0x108] sm:$0xff]  ;;  %v262_v37 = vld [vmem:[%s2531_s28 + $0x110] sm:$0xff]  ;;  %v263_v38 = vld [vmem:[%s2531_s28 + $0x118] sm:$0xff] }
  0x1c   : > { %v264_v39 = vld [vmem:[%s2531_s28 + $0x120] sm:$0xff]  ;;  %v265_v40 = vld [vmem:[%s2531_s28 + $0x128] sm:$0xff]  ;;  %v266_v41 = vld [vmem:[%s2531_s28 + $0x130] sm:$0xff] }
  0x1d   : > { %v267_v42 = vld [vmem:[%s2531_s28 + $0x138] sm:$0xff]  ;;  %v268_v43 = vld [vmem:[%s2531_s28 + $0x140] sm:$0xff]  ;;  %v269_v44 = vld [vmem:[%s2531_s28 + $0x148] sm:$0xff] }
  0x1e   : > { %2261 = vmatmul.mubr.msk.f32.gmra.mrb[6].mxu0 %vm301_vm0, %v235_v10  ;;  %v270_v45 = vld [vmem:[%s2531_s28 + $0x150] sm:$0xff]  ;;  %v271_v48 = vld [vmem:[%s2531_s28 + $0x158] sm:$0xff]  ;;  %v272_v50 = vld [vmem:[%s2531_s28 + $0x160] sm:$0xff] }
  0x1f   : > { %2263 = vmatprep.mubr.msk.f32.mxu0 %vm301_vm0, %v236_v11  ;;  %v273_v53 = vld [vmem:[%s2531_s28 + $0x168] sm:$0xff]  ;;  %v274_v55 = vld [vmem:[%s2531_s28 + $0x170] sm:$0xff]  ;;  %v275_v56 = vld [vmem:[%s2531_s28 + $0x178] sm:$0xff] }
  0x20   : > { %v276_v57 = vld [vmem:[%s2531_s28 + $0x180] sm:$0xff]  ;;  %v277_v58 = vld [vmem:[%s2531_s28 + $0x188] sm:$0xff]  ;;  %v278_v59 = vld [vmem:[%s2531_s28 + $0x190] sm:$0xff] }
  0x21   : > { %v279_v60 = vld [vmem:[%s2531_s28 + $0x198] sm:$0xff]  ;;  %v280_v61 = vld [vmem:[%s2531_s28 + $0x1a0] sm:$0xff]  ;;  %v281_v62 = vld [vmem:[%s2531_s28 + $0x1a8] sm:$0xff] }
  0x22   : > { %2264 = vmatmul.mubr.msk.f32.gmra.mrb[8].mxu0 %vm301_vm0, %v237_v12  ;;  %v282_v63 = vld [vmem:[%s2531_s28 + $0x1b0] sm:$0xff]  ;;  %v283_v0 = vld [vmem:[%s2531_s28 + $0x1b8] sm:$0xff]  ;;  %v284_v1 = vld [vmem:[%s2531_s28 + $0x1c0] sm:$0xff] }
  0x23   : > { %2266 = vmatprep.mubr.msk.f32.mxu0 %vm301_vm0, %v238_v13  ;;  %v285_v2 = vld [vmem:[%s2531_s28 + $0x1c8] sm:$0xff]  ;;  %v286_v3 = vld [vmem:[%s2531_s28 + $0x1d0] sm:$0xff]  ;;  %v287_v4 = vld [vmem:[%s2531_s28 + $0x1d8] sm:$0xff] }
  0x24   : > { %v288_v5 = vld [vmem:[%s2531_s28 + $0x1e0] sm:$0xff]  ;;  %v289_v6 = vld [vmem:[%s2531_s28 + $0x1e8] sm:$0xff]  ;;  %v290_v7 = vld [vmem:[%s2531_s28 + $0x1f0] sm:$0xff] }
  0x25   : > { %v291_v8 = vld [vmem:[%s2531_s28 + $0x1f8] sm:$0xff]  ;;  %v2676_v9 = vld [vmem:[%s2951_s2] ss:$0 sm:$0xff] }
  0x26   : > { %2267 = vmatmul.mubr.msk.f32.gmra.mrb[10].mxu0 %vm301_vm0, %v239_v14 }
  0x27   : > { %2269 = vmatprep.mubr.msk.f32.mxu0 %vm301_vm0, %v240_v15 }
  0x2a   : > { %2270 = vmatmul.mubr.msk.f32.gmra.mrb[12].mxu0 %vm301_vm0, %v241_v16 }
  0x2b   : > { %2272 = vmatprep.mubr.msk.f32.mxu0 %vm301_vm0, %v242_v17 }
  0x2e   : > { %2273 = vmatmul.mubr.msk.f32.gmra.mrb[14].mxu0 %vm301_vm0, %v243_v18 }
  0x2f   : > { %2275 = vmatprep.mubr.msk.f32.mxu0 %vm301_vm0, %v244_v19 }
  0x32   : > { %2276 = vmatmul.mubr.msk.f32.gmra.mrb[16].mxu0 %vm301_vm0, %v245_v20 }
  0x33   : > { %2278 = vmatprep.mubr.msk.f32.mxu0 %vm301_vm0, %v246_v21 }
  0x36   : > { %2279 = vmatmul.mubr.msk.f32.gmra.mrb[18].mxu0 %vm301_vm0, %v247_v22 }
  0x37   : > { %2281 = vmatprep.mubr.msk.f32.mxu0 %vm301_vm0, %v248_v23 }
  0x3a   : > { %2282 = vmatmul.mubr.msk.f32.gmra.mrb[20].mxu0 %vm301_vm0, %v249_v24 }
  0x3b   : > { %2284 = vmatprep.mubr.msk.f32.mxu0 %vm301_vm0, %v250_v25 }
  0x3e   : > { %2285 = vmatmul.mubr.msk.f32.gmra.mrb[22].mxu0 %vm301_vm0, %v251_v26 }
  0x3f   : > { %2287 = vmatprep.mubr.msk.f32.mxu0 %vm301_vm0, %v252_v27 }
  0x42   : > { %2288 = vmatmul.mubr.msk.f32.gmra.mrb[24].mxu0 %vm301_vm0, %v253_v28 }
  0x43   : > { %2290 = vmatprep.mubr.msk.f32.mxu0 %vm301_vm0, %v254_v29 }
  0x46   : > { %2291 = vmatmul.mubr.msk.f32.gmra.mrb[26].mxu0 %vm301_vm0, %v255_v30 }
  0x47   : > { %2293 = vmatprep.mubr.msk.f32.mxu0 %vm301_vm0, %v256_v31 }
  0x4a   : > { %2294 = vmatmul.mubr.msk.f32.gmra.mrb[28].mxu0 %vm301_vm0, %v257_v32 }
  0x4b   : > { %2296 = vmatprep.mubr.msk.f32.mxu0 %vm301_vm0, %v258_v33 }
  0x4e   : > { %2297 = vmatmul.mubr.msk.f32.gmra.mrb[30].mxu0 %vm301_vm0, %v259_v34 }
  0x4f   : > { %2299 = vmatprep.mubr.msk.f32.mxu0 %vm301_vm0, %v260_v35 }
  0x52   : > { %2300 = vmatmul.mubr.msk.f32.gmra.mrb[32].mxu0 %vm301_vm0, %v261_v36 }
  0x53   : > { %2302 = vmatprep.mubr.msk.f32.mxu0 %vm301_vm0, %v262_v37 }
  0x56   : > { %2303 = vmatmul.mubr.msk.f32.gmra.mrb[34].mxu0 %vm301_vm0, %v263_v38 }
  0x57   : > { %2305 = vmatprep.mubr.msk.f32.mxu0 %vm301_vm0, %v264_v39 }
  0x5a   : > { %2306 = vmatmul.mubr.msk.f32.gmra.mrb[36].mxu0 %vm301_vm0, %v265_v40 }
  0x5b   : > { %2308 = vmatprep.mubr.msk.f32.mxu0 %vm301_vm0, %v266_v41 }
  0x5e   : > { %2309 = vmatmul.mubr.msk.f32.gmra.mrb[38].mxu0 %vm301_vm0, %v267_v42 }
  0x5f   : > { %2311 = vmatprep.mubr.msk.f32.mxu0 %vm301_vm0, %v268_v43 }
  0x62   : > { %2312 = vmatmul.mubr.msk.f32.gmra.mrb[40].mxu0 %vm301_vm0, %v269_v44 }
  0x63   : > { %2314 = vmatprep.mubr.msk.f32.mxu0 %vm301_vm0, %v270_v45 }
  0x66   : > { %2315 = vmatmul.mubr.msk.f32.gmra.mrb[42].mxu0 %vm301_vm0, %v271_v48 }
  0x67   : > { %2317 = vmatprep.mubr.msk.f32.mxu0 %vm301_vm0, %v272_v50 }
  0x6a   : > { %2318 = vmatmul.mubr.msk.f32.gmra.mrb[44].mxu0 %vm301_vm0, %v273_v53 }
  0x6b   : > { %2320 = vmatprep.mubr.msk.f32.mxu0 %vm301_vm0, %v274_v55 }
  0x6e   : > { %2321 = vmatmul.mubr.msk.f32.gmra.mrb[46].mxu0 %vm301_vm0, %v275_v56 }
  0x6f   : > { %2323 = vmatprep.mubr.msk.f32.mxu0 %vm301_vm0, %v276_v57 }
  0x72   : > { %2324 = vmatmul.mubr.msk.f32.gmra.mrb[48].mxu0 %vm301_vm0, %v277_v58 }
  0x73   : > { %2326 = vmatprep.mubr.msk.f32.mxu0 %vm301_vm0, %v278_v59 }
  0x76   : > { %2327 = vmatmul.mubr.msk.f32.gmra.mrb[50].mxu0 %vm301_vm0, %v279_v60 }
  0x77   : > { %2329 = vmatprep.mubr.msk.f32.mxu0 %vm301_vm0, %v280_v61 }
  0x7a   : > { %2330 = vmatmul.mubr.msk.f32.gmra.mrb[52].mxu0 %vm301_vm0, %v281_v62 }
  0x7b   : > { %2332 = vmatprep.mubr.msk.f32.mxu0 %vm301_vm0, %v282_v63 }
  0x7e   : > { %2333 = vmatmul.mubr.msk.f32.gmra.mrb[54].mxu0 %vm301_vm0, %v283_v0 }
  0x7f   : > { %2335 = vmatprep.mubr.msk.f32.mxu0 %vm301_vm0, %v284_v1 }
  0x82   : > { %2336 = vmatmul.mubr.msk.f32.gmra.mrb[56].mxu0 %vm301_vm0, %v285_v2 }
  0x83   : > { %2338 = vmatprep.mubr.msk.f32.mxu0 %vm301_vm0, %v286_v3 }
  0x86   : > { %2339 = vmatmul.mubr.msk.f32.gmra.mrb[58].mxu0 %vm301_vm0, %v287_v4 }
  0x87   : > { %2341 = vmatprep.mubr.msk.f32.mxu0 %vm301_vm0, %v288_v5 }
  0x8a   : > { %2342 = vmatmul.mubr.msk.f32.gmra.mrb[60].mxu0 %vm301_vm0, %v289_v6 }
  0x8b   : > { %2344 = vmatprep.mubr.msk.f32.mxu0 %vm301_vm0, %v290_v7 }
  0x8e   : > { %2345 = vmatmul.mubr.msk.f32.gmra.mrb[62].mxu0 %vm301_vm0, %v291_v8 }
  0xe5   : > { %v2253_v10 = vpop.f32.mrb[0].mxu0 }
  0xe6   : > { %v566_v11 = vadd.f32 %v2253_v10, %v2676_v9  ;;  %v560_v12 = vpop.f32.mrb[1].mxu0 }
  0xe7   : > { %v561_v13 = vadd.f32 %v2676_v9, %v560_v12 }
  0xe8   : > { %v944_v14 = vmul.f32 0.1, %v566_v11  ;;  %vm880_vm1 = vcmp.ge.f32.partialorder %v566_v11, 0.0 }
  0xe9   : > { %v2256_v15 = vpop.f32.mrb[2].mxu0  ;;  %vm879_vm2 = vcmp.ge.f32.partialorder %v561_v13, 0.0  ;;  %v943_v16 = vmul.f32 0.1, %v561_v13 }
  0xea   : > { %v576_v17 = vadd.f32 %v2256_v15, %v2676_v9  ;;  %v570_v18 = vpop.f32.mrb[3].mxu0  ;;  %v1008_v22 = vsel %vm880_vm1, %v566_v11, %v944_v14 }
  0xeb   : > { %v571_v19 = vadd.f32 %v2676_v9, %v570_v18  ;;  %v1007_v20 = vsel %vm879_vm2, %v561_v13, %v943_v16 }
  0xec   : > { %v946_v21 = vmul.f32 0.1, %v576_v17  ;;  %2355 = vmatprep.mubr.msk.f32.mxu1 %vm1082_vm3, %v1007_v20  ;;  %vm882_vm4 = vcmp.ge.f32.partialorder %v576_v17, 0.0 }
  0xed   : > { %vm881_vm5 = vcmp.ge.f32.partialorder %v571_v19, 0.0  ;;  %v945_v23 = vmul.f32 0.1, %v571_v19  ;;  %v2259_v24 = vpop.f32.mrb[4].mxu0  ;;  %2356 = vmatmul.mubr.msk.f32.vlgmr.msra.gmra.mrb[0].mxu1 %vm1082_vm3, %v1008_v22 }
  0xee   : > { %v586_v25 = vadd.f32 %v2259_v24, %v2676_v9  ;;  %v580_v26 = vpop.f32.mrb[5].mxu0  ;;  %v1010_v30 = vsel %vm882_vm4, %v576_v17, %v946_v21 }
  0xef   : > { %v581_v27 = vadd.f32 %v2676_v9, %v580_v26  ;;  %v1009_v28 = vsel %vm881_vm5, %v571_v19, %v945_v23 }
  0xf0   : > { %v948_v29 = vmul.f32 0.1, %v586_v25  ;;  %2358 = vmatprep.mubr.msk.f32.mxu1 %vm1082_vm3, %v1009_v28  ;;  %vm884_vm6 = vcmp.ge.f32.partialorder %v586_v25, 0.0 }
  0xf1   : > { %vm883_vm7 = vcmp.ge.f32.partialorder %v581_v27, 0.0  ;;  %v947_v31 = vmul.f32 0.1, %v581_v27  ;;  %v2262_v32 = vpop.f32.mrb[6].mxu0  ;;  %2359 = vmatmul.mubr.msk.f32.gmra.mrb[2].mxu1 %vm1082_vm3, %v1010_v30 }
  0xf2   : > { %v596_v33 = vadd.f32 %v2262_v32, %v2676_v9  ;;  %v590_v34 = vpop.f32.mrb[7].mxu0  ;;  %v1012_v38 = vsel %vm884_vm6, %v586_v25, %v948_v29 }
  0xf3   : > { %v591_v35 = vadd.f32 %v2676_v9, %v590_v34  ;;  %v1011_v36 = vsel %vm883_vm7, %v581_v27, %v947_v31 }
  0xf4   : > { %v950_v37 = vmul.f32 0.1, %v596_v33  ;;  %2361 = vmatprep.mubr.msk.f32.mxu1 %vm1082_vm3, %v1011_v36  ;;  %vm886_vm8 = vcmp.ge.f32.partialorder %v596_v33, 0.0 }
  0xf5   : > { %vm885_vm9 = vcmp.ge.f32.partialorder %v591_v35, 0.0  ;;  %v949_v39 = vmul.f32 0.1, %v591_v35  ;;  %v2265_v40 = vpop.f32.mrb[8].mxu0  ;;  %2362 = vmatmul.mubr.msk.f32.gmra.mrb[4].mxu1 %vm1082_vm3, %v1012_v38 }
  0xf6   : > { %v606_v41 = vadd.f32 %v2265_v40, %v2676_v9  ;;  %v600_v42 = vpop.f32.mrb[9].mxu0  ;;  %v1014_v46 = vsel %vm886_vm8, %v596_v33, %v950_v37 }
  0xf7   : > { %v601_v43 = vadd.f32 %v2676_v9, %v600_v42  ;;  %v1013_v44 = vsel %vm885_vm9, %v591_v35, %v949_v39 }
  0xf8   : > { %v952_v45 = vmul.f32 0.1, %v606_v41  ;;  %2364 = vmatprep.mubr.msk.f32.mxu1 %vm1082_vm3, %v1013_v44  ;;  %vm888_vm10 = vcmp.ge.f32.partialorder %v606_v41, 0.0 }
  0xf9   : > { %vm887_vm11 = vcmp.ge.f32.partialorder %v601_v43, 0.0  ;;  %v951_v47 = vmul.f32 0.1, %v601_v43  ;;  %v2268_v48 = vpop.f32.mrb[10].mxu0  ;;  %2365 = vmatmul.mubr.msk.f32.gmra.mrb[6].mxu1 %vm1082_vm3, %v1014_v46 }
  0xfa   : > { %v616_v49 = vadd.f32 %v2268_v48, %v2676_v9  ;;  %v610_v50 = vpop.f32.mrb[11].mxu0  ;;  %v1016_v54 = vsel %vm888_vm10, %v606_v41, %v952_v45 }
  0xfb   : > { %v611_v51 = vadd.f32 %v2676_v9, %v610_v50  ;;  %v1015_v52 = vsel %vm887_vm11, %v601_v43, %v951_v47 }
  0xfc   : > { %v954_v53 = vmul.f32 0.1, %v616_v49  ;;  %2367 = vmatprep.mubr.msk.f32.mxu1 %vm1082_vm3, %v1015_v52  ;;  %vm890_vm12 = vcmp.ge.f32.partialorder %v616_v49, 0.0 }
  0xfd   : > { %vm889_vm13 = vcmp.ge.f32.partialorder %v611_v51, 0.0  ;;  %v953_v55 = vmul.f32 0.1, %v611_v51  ;;  %v2271_v56 = vpop.f32.mrb[12].mxu0  ;;  %2368 = vmatmul.mubr.msk.f32.gmra.mrb[8].mxu1 %vm1082_vm3, %v1016_v54 }
  0xfe   : > { %v626_v57 = vadd.f32 %v2271_v56, %v2676_v9  ;;  %v620_v58 = vpop.f32.mrb[13].mxu0  ;;  %v1018_v62 = vsel %vm890_vm12, %v616_v49, %v954_v53 }
  0xff   : > { %v621_v59 = vadd.f32 %v2676_v9, %v620_v58  ;;  %v1017_v60 = vsel %vm889_vm13, %v611_v51, %v953_v55 }
 0x100   : > { %v956_v61 = vmul.f32 0.1, %v626_v57  ;;  %2370 = vmatprep.mubr.msk.f32.mxu1 %vm1082_vm3, %v1017_v60  ;;  %vm892_vm14 = vcmp.ge.f32.partialorder %v626_v57, 0.0 }
 0x101   : > { %vm891_vm15 = vcmp.ge.f32.partialorder %v621_v59, 0.0  ;;  %v955_v63 = vmul.f32 0.1, %v621_v59  ;;  %v2274_v0 = vpop.f32.mrb[14].mxu0  ;;  %2371 = vmatmul.mubr.msk.f32.gmra.mrb[10].mxu1 %vm1082_vm3, %v1018_v62 }
 0x102   : > { %v636_v1 = vadd.f32 %v2274_v0, %v2676_v9  ;;  %v630_v2 = vpop.f32.mrb[15].mxu0  ;;  %v1020_v6 = vsel %vm892_vm14, %v626_v57, %v956_v61 }
 0x103   : > { %v631_v3 = vadd.f32 %v2676_v9, %v630_v2  ;;  %v1019_v4 = vsel %vm891_vm15, %v621_v59, %v955_v63 }
 0x104   : > { %v958_v5 = vmul.f32 0.1, %v636_v1  ;;  %2373 = vmatprep.mubr.msk.f32.mxu1 %vm1082_vm3, %v1019_v4  ;;  %vm894_vm0 = vcmp.ge.f32.partialorder %v636_v1, 0.0 }
 0x105   : > { %vm893_vm1 = vcmp.ge.f32.partialorder %v631_v3, 0.0  ;;  %v957_v7 = vmul.f32 0.1, %v631_v3  ;;  %v2277_v8 = vpop.f32.mrb[16].mxu0  ;;  %2374 = vmatmul.mubr.msk.f32.gmra.mrb[12].mxu1 %vm1082_vm3, %v1020_v6 }
 0x106   : > { %v646_v10 = vadd.f32 %v2277_v8, %v2676_v9  ;;  %v640_v11 = vpop.f32.mrb[17].mxu0  ;;  %v1022_v15 = vsel %vm894_vm0, %v636_v1, %v958_v5 }
 0x107   : > { %v641_v12 = vadd.f32 %v2676_v9, %v640_v11  ;;  %v1021_v13 = vsel %vm893_vm1, %v631_v3, %v957_v7 }
 0x108   : > { %v960_v14 = vmul.f32 0.1, %v646_v10  ;;  %2376 = vmatprep.mubr.msk.f32.mxu1 %vm1082_vm3, %v1021_v13  ;;  %vm896_vm2 = vcmp.ge.f32.partialorder %v646_v10, 0.0 }
 0x109   : > { %vm895_vm4 = vcmp.ge.f32.partialorder %v641_v12, 0.0  ;;  %v959_v16 = vmul.f32 0.1, %v641_v12  ;;  %v2280_v17 = vpop.f32.mrb[18].mxu0  ;;  %2377 = vmatmul.mubr.msk.f32.gmra.mrb[14].mxu1 %vm1082_vm3, %v1022_v15 }
 0x10a   : > { %v656_v18 = vadd.f32 %v2280_v17, %v2676_v9  ;;  %v650_v19 = vpop.f32.mrb[19].mxu0  ;;  %v1024_v23 = vsel %vm896_vm2, %v646_v10, %v960_v14 }
 0x10b   : > { %v651_v20 = vadd.f32 %v2676_v9, %v650_v19  ;;  %v1023_v21 = vsel %vm895_vm4, %v641_v12, %v959_v16 }
 0x10c   : > { %v962_v22 = vmul.f32 0.1, %v656_v18  ;;  %2379 = vmatprep.mubr.msk.f32.mxu1 %vm1082_vm3, %v1023_v21  ;;  %vm898_vm5 = vcmp.ge.f32.partialorder %v656_v18, 0.0 }
 0x10d   : > { %vm897_vm6 = vcmp.ge.f32.partialorder %v651_v20, 0.0  ;;  %v961_v24 = vmul.f32 0.1, %v651_v20  ;;  %v2283_v25 = vpop.f32.mrb[20].mxu0  ;;  %2380 = vmatmul.mubr.msk.f32.gmra.mrb[16].mxu1 %vm1082_vm3, %v1024_v23 }
 0x10e   : > { %v666_v26 = vadd.f32 %v2283_v25, %v2676_v9  ;;  %v660_v27 = vpop.f32.mrb[21].mxu0  ;;  %v1026_v31 = vsel %vm898_vm5, %v656_v18, %v962_v22 }
 0x10f   : > { %v661_v28 = vadd.f32 %v2676_v9, %v660_v27  ;;  %v1025_v29 = vsel %vm897_vm6, %v651_v20, %v961_v24 }
 0x110   : > { %v964_v30 = vmul.f32 0.1, %v666_v26  ;;  %2382 = vmatprep.mubr.msk.f32.mxu1 %vm1082_vm3, %v1025_v29  ;;  %vm900_vm7 = vcmp.ge.f32.partialorder %v666_v26, 0.0 }
 0x111   : > { %vm899_vm8 = vcmp.ge.f32.partialorder %v661_v28, 0.0  ;;  %v963_v32 = vmul.f32 0.1, %v661_v28  ;;  %v2286_v33 = vpop.f32.mrb[22].mxu0  ;;  %2383 = vmatmul.mubr.msk.f32.gmra.mrb[18].mxu1 %vm1082_vm3, %v1026_v31 }
 0x112   : > { %v676_v34 = vadd.f32 %v2286_v33, %v2676_v9  ;;  %v670_v35 = vpop.f32.mrb[23].mxu0  ;;  %v1028_v39 = vsel %vm900_vm7, %v666_v26, %v964_v30 }
 0x113   : > { %v671_v36 = vadd.f32 %v2676_v9, %v670_v35  ;;  %v1027_v37 = vsel %vm899_vm8, %v661_v28, %v963_v32 }
 0x114   : > { %v966_v38 = vmul.f32 0.1, %v676_v34  ;;  %2385 = vmatprep.mubr.msk.f32.mxu1 %vm1082_vm3, %v1027_v37  ;;  %vm902_vm9 = vcmp.ge.f32.partialorder %v676_v34, 0.0 }
 0x115   : > { %vm901_vm10 = vcmp.ge.f32.partialorder %v671_v36, 0.0  ;;  %v965_v40 = vmul.f32 0.1, %v671_v36  ;;  %v2289_v41 = vpop.f32.mrb[24].mxu0  ;;  %2386 = vmatmul.mubr.msk.f32.gmra.mrb[20].mxu1 %vm1082_vm3, %v1028_v39 }
 0x116   : > { %v686_v42 = vadd.f32 %v2289_v41, %v2676_v9  ;;  %v680_v43 = vpop.f32.mrb[25].mxu0  ;;  %v1030_v47 = vsel %vm902_vm9, %v676_v34, %v966_v38 }
 0x117   : > { %v681_v44 = vadd.f32 %v2676_v9, %v680_v43  ;;  %v1029_v45 = vsel %vm901_vm10, %v671_v36, %v965_v40 }
 0x118   : > { %v968_v46 = vmul.f32 0.1, %v686_v42  ;;  %2388 = vmatprep.mubr.msk.f32.mxu1 %vm1082_vm3, %v1029_v45  ;;  %vm904_vm11 = vcmp.ge.f32.partialorder %v686_v42, 0.0 }
 0x119   : > { %vm903_vm12 = vcmp.ge.f32.partialorder %v681_v44, 0.0  ;;  %v967_v48 = vmul.f32 0.1, %v681_v44  ;;  %v2292_v49 = vpop.f32.mrb[26].mxu0  ;;  %2389 = vmatmul.mubr.msk.f32.gmra.mrb[22].mxu1 %vm1082_vm3, %v1030_v47 }
 0x11a   : > { %v696_v50 = vadd.f32 %v2292_v49, %v2676_v9  ;;  %v690_v51 = vpop.f32.mrb[27].mxu0  ;;  %v1032_v55 = vsel %vm904_vm11, %v686_v42, %v968_v46 }
 0x11b   : > { %v691_v52 = vadd.f32 %v2676_v9, %v690_v51  ;;  %v1031_v53 = vsel %vm903_vm12, %v681_v44, %v967_v48 }
 0x11c   : > { %v970_v54 = vmul.f32 0.1, %v696_v50  ;;  %2391 = vmatprep.mubr.msk.f32.mxu1 %vm1082_vm3, %v1031_v53  ;;  %vm906_vm13 = vcmp.ge.f32.partialorder %v696_v50, 0.0 }
 0x11d   : > { %vm905_vm14 = vcmp.ge.f32.partialorder %v691_v52, 0.0  ;;  %v969_v56 = vmul.f32 0.1, %v691_v52  ;;  %v2295_v57 = vpop.f32.mrb[28].mxu0  ;;  %2392 = vmatmul.mubr.msk.f32.gmra.mrb[24].mxu1 %vm1082_vm3, %v1032_v55 }
 0x11e   : > { %v706_v58 = vadd.f32 %v2295_v57, %v2676_v9  ;;  %v700_v59 = vpop.f32.mrb[29].mxu0  ;;  %v1034_v63 = vsel %vm906_vm13, %v696_v50, %v970_v54 }
 0x11f   : > { %v701_v60 = vadd.f32 %v2676_v9, %v700_v59  ;;  %v1033_v61 = vsel %vm905_vm14, %v691_v52, %v969_v56 }
 0x120   : > { %v972_v62 = vmul.f32 0.1, %v706_v58  ;;  %2394 = vmatprep.mubr.msk.f32.mxu1 %vm1082_vm3, %v1033_v61  ;;  %vm908_vm15 = vcmp.ge.f32.partialorder %v706_v58, 0.0 }
 0x121   : > { %vm907_vm0 = vcmp.ge.f32.partialorder %v701_v60, 0.0  ;;  %v971_v0 = vmul.f32 0.1, %v701_v60  ;;  %v2298_v1 = vpop.f32.mrb[30].mxu0  ;;  %2395 = vmatmul.mubr.msk.f32.gmra.mrb[26].mxu1 %vm1082_vm3, %v1034_v63 }
 0x122   : > { %v716_v2 = vadd.f32 %v2298_v1, %v2676_v9  ;;  %v710_v3 = vpop.f32.mrb[31].mxu0  ;;  %v1036_v7 = vsel %vm908_vm15, %v706_v58, %v972_v62 }
 0x123   : > { %v711_v4 = vadd.f32 %v2676_v9, %v710_v3  ;;  %v1035_v5 = vsel %vm907_vm0, %v701_v60, %v971_v0 }
 0x124   : > { %v974_v6 = vmul.f32 0.1, %v716_v2  ;;  %2397 = vmatprep.mubr.msk.f32.mxu1 %vm1082_vm3, %v1035_v5  ;;  %vm910_vm1 = vcmp.ge.f32.partialorder %v716_v2, 0.0 }
 0x125   : > { %vm909_vm2 = vcmp.ge.f32.partialorder %v711_v4, 0.0  ;;  %v973_v8 = vmul.f32 0.1, %v711_v4  ;;  %v2301_v10 = vpop.f32.mrb[32].mxu0  ;;  %2398 = vmatmul.mubr.msk.f32.gmra.mrb[28].mxu1 %vm1082_vm3, %v1036_v7 }
 0x126   : > { %v726_v11 = vadd.f32 %v2301_v10, %v2676_v9  ;;  %v720_v12 = vpop.f32.mrb[33].mxu0  ;;  %v1038_v16 = vsel %vm910_vm1, %v716_v2, %v974_v6 }
 0x127   : > { %v721_v13 = vadd.f32 %v2676_v9, %v720_v12  ;;  %v1037_v14 = vsel %vm909_vm2, %v711_v4, %v973_v8 }
 0x128   : > { %v976_v15 = vmul.f32 0.1, %v726_v11  ;;  %2400 = vmatprep.mubr.msk.f32.mxu1 %vm1082_vm3, %v1037_v14  ;;  %vm912_vm4 = vcmp.ge.f32.partialorder %v726_v11, 0.0 }
 0x129   : > { %vm911_vm5 = vcmp.ge.f32.partialorder %v721_v13, 0.0  ;;  %v975_v17 = vmul.f32 0.1, %v721_v13  ;;  %v2304_v18 = vpop.f32.mrb[34].mxu0  ;;  %2401 = vmatmul.mubr.msk.f32.gmra.mrb[30].mxu1 %vm1082_vm3, %v1038_v16 }
 0x12a   : > { %v736_v19 = vadd.f32 %v2304_v18, %v2676_v9  ;;  %v730_v20 = vpop.f32.mrb[35].mxu0  ;;  %v1040_v24 = vsel %vm912_vm4, %v726_v11, %v976_v15 }
 0x12b   : > { %v731_v21 = vadd.f32 %v2676_v9, %v730_v20  ;;  %v1039_v22 = vsel %vm911_vm5, %v721_v13, %v975_v17 }
 0x12c   : > { %v978_v23 = vmul.f32 0.1, %v736_v19  ;;  %2403 = vmatprep.mubr.msk.f32.mxu1 %vm1082_vm3, %v1039_v22  ;;  %vm914_vm6 = vcmp.ge.f32.partialorder %v736_v19, 0.0 }
 0x12d   : > { %vm913_vm7 = vcmp.ge.f32.partialorder %v731_v21, 0.0  ;;  %v977_v25 = vmul.f32 0.1, %v731_v21  ;;  %v2307_v26 = vpop.f32.mrb[36].mxu0  ;;  %2404 = vmatmul.mubr.msk.f32.gmra.mrb[32].mxu1 %vm1082_vm3, %v1040_v24 }
 0x12e   : > { %v746_v27 = vadd.f32 %v2307_v26, %v2676_v9  ;;  %v740_v28 = vpop.f32.mrb[37].mxu0  ;;  %v1042_v32 = vsel %vm914_vm6, %v736_v19, %v978_v23 }
 0x12f   : > { %v741_v29 = vadd.f32 %v2676_v9, %v740_v28  ;;  %v1041_v30 = vsel %vm913_vm7, %v731_v21, %v977_v25 }
 0x130   : > { %v980_v31 = vmul.f32 0.1, %v746_v27  ;;  %2406 = vmatprep.mubr.msk.f32.mxu1 %vm1082_vm3, %v1041_v30  ;;  %vm916_vm8 = vcmp.ge.f32.partialorder %v746_v27, 0.0 }
 0x131   : > { %vm915_vm9 = vcmp.ge.f32.partialorder %v741_v29, 0.0  ;;  %v979_v33 = vmul.f32 0.1, %v741_v29  ;;  %v2310_v34 = vpop.f32.mrb[38].mxu0  ;;  %2407 = vmatmul.mubr.msk.f32.gmra.mrb[34].mxu1 %vm1082_vm3, %v1042_v32 }
 0x132   : > { %v756_v35 = vadd.f32 %v2310_v34, %v2676_v9  ;;  %v750_v36 = vpop.f32.mrb[39].mxu0  ;;  %v1044_v40 = vsel %vm916_vm8, %v746_v27, %v980_v31 }
 0x133   : > { %v751_v37 = vadd.f32 %v2676_v9, %v750_v36  ;;  %v1043_v38 = vsel %vm915_vm9, %v741_v29, %v979_v33 }
 0x134   : > { %v982_v39 = vmul.f32 0.1, %v756_v35  ;;  %2409 = vmatprep.mubr.msk.f32.mxu1 %vm1082_vm3, %v1043_v38  ;;  %vm918_vm10 = vcmp.ge.f32.partialorder %v756_v35, 0.0 }
 0x135   : > { %vm917_vm11 = vcmp.ge.f32.partialorder %v751_v37, 0.0  ;;  %v981_v41 = vmul.f32 0.1, %v751_v37  ;;  %v2313_v42 = vpop.f32.mrb[40].mxu0  ;;  %2410 = vmatmul.mubr.msk.f32.gmra.mrb[36].mxu1 %vm1082_vm3, %v1044_v40 }
 0x136   : > { %v766_v43 = vadd.f32 %v2313_v42, %v2676_v9  ;;  %v760_v44 = vpop.f32.mrb[41].mxu0  ;;  %v1046_v48 = vsel %vm918_vm10, %v756_v35, %v982_v39 }
 0x137   : > { %v761_v45 = vadd.f32 %v2676_v9, %v760_v44  ;;  %v1045_v46 = vsel %vm917_vm11, %v751_v37, %v981_v41 }
 0x138   : > { %v984_v47 = vmul.f32 0.1, %v766_v43  ;;  %2412 = vmatprep.mubr.msk.f32.mxu1 %vm1082_vm3, %v1045_v46  ;;  %vm920_vm12 = vcmp.ge.f32.partialorder %v766_v43, 0.0 }
 0x139   : > { %vm919_vm13 = vcmp.ge.f32.partialorder %v761_v45, 0.0  ;;  %v983_v49 = vmul.f32 0.1, %v761_v45  ;;  %v2316_v50 = vpop.f32.mrb[42].mxu0  ;;  %2413 = vmatmul.mubr.msk.f32.gmra.mrb[38].mxu1 %vm1082_vm3, %v1046_v48 }
 0x13a   : > { %v776_v51 = vadd.f32 %v2316_v50, %v2676_v9  ;;  %v770_v52 = vpop.f32.mrb[43].mxu0  ;;  %v1048_v56 = vsel %vm920_vm12, %v766_v43, %v984_v47 }
 0x13b   : > { %v771_v53 = vadd.f32 %v2676_v9, %v770_v52  ;;  %v1047_v54 = vsel %vm919_vm13, %v761_v45, %v983_v49 }
 0x13c   : > { %v986_v55 = vmul.f32 0.1, %v776_v51  ;;  %2415 = vmatprep.mubr.msk.f32.mxu1 %vm1082_vm3, %v1047_v54  ;;  %vm922_vm14 = vcmp.ge.f32.partialorder %v776_v51, 0.0 }
 0x13d   : > { %vm921_vm15 = vcmp.ge.f32.partialorder %v771_v53, 0.0  ;;  %v985_v57 = vmul.f32 0.1, %v771_v53  ;;  %v2319_v58 = vpop.f32.mrb[44].mxu0  ;;  %2416 = vmatmul.mubr.msk.f32.gmra.mrb[40].mxu1 %vm1082_vm3, %v1048_v56 }
 0x13e   : > { %v786_v59 = vadd.f32 %v2319_v58, %v2676_v9  ;;  %v780_v60 = vpop.f32.mrb[45].mxu0  ;;  %v1050_v0 = vsel %vm922_vm14, %v776_v51, %v986_v55 }
 0x13f   : > { %v781_v61 = vadd.f32 %v2676_v9, %v780_v60  ;;  %v1049_v62 = vsel %vm921_vm15, %v771_v53, %v985_v57 }
 0x140   : > { %v988_v63 = vmul.f32 0.1, %v786_v59  ;;  %2418 = vmatprep.mubr.msk.f32.mxu1 %vm1082_vm3, %v1049_v62  ;;  %vm924_vm0 = vcmp.ge.f32.partialorder %v786_v59, 0.0 }
 0x141   : > { %vm923_vm1 = vcmp.ge.f32.partialorder %v781_v61, 0.0  ;;  %v987_v1 = vmul.f32 0.1, %v781_v61  ;;  %v2322_v2 = vpop.f32.mrb[46].mxu0  ;;  %2419 = vmatmul.mubr.msk.f32.gmra.mrb[42].mxu1 %vm1082_vm3, %v1050_v0 }
 0x142   : > { %v796_v3 = vadd.f32 %v2322_v2, %v2676_v9  ;;  %v790_v4 = vpop.f32.mrb[47].mxu0  ;;  %v1052_v8 = vsel %vm924_vm0, %v786_v59, %v988_v63 }
 0x143   : > { %v791_v5 = vadd.f32 %v2676_v9, %v790_v4  ;;  %v1051_v6 = vsel %vm923_vm1, %v781_v61, %v987_v1 }
 0x144   : > { %v990_v7 = vmul.f32 0.1, %v796_v3  ;;  %2421 = vmatprep.mubr.msk.f32.mxu1 %vm1082_vm3, %v1051_v6  ;;  %vm926_vm2 = vcmp.ge.f32.partialorder %v796_v3, 0.0 }
 0x145   : > { %vm925_vm4 = vcmp.ge.f32.partialorder %v791_v5, 0.0  ;;  %v989_v10 = vmul.f32 0.1, %v791_v5  ;;  %v2325_v11 = vpop.f32.mrb[48].mxu0  ;;  %2422 = vmatmul.mubr.msk.f32.gmra.mrb[44].mxu1 %vm1082_vm3, %v1052_v8 }
 0x146   : > { %v806_v12 = vadd.f32 %v2325_v11, %v2676_v9  ;;  %v800_v13 = vpop.f32.mrb[49].mxu0  ;;  %v1054_v17 = vsel %vm926_vm2, %v796_v3, %v990_v7 }
 0x147   : > { %v801_v14 = vadd.f32 %v2676_v9, %v800_v13  ;;  %v1053_v15 = vsel %vm925_vm4, %v791_v5, %v989_v10 }
 0x148   : > { %v992_v16 = vmul.f32 0.1, %v806_v12  ;;  %2424 = vmatprep.mubr.msk.f32.mxu1 %vm1082_vm3, %v1053_v15  ;;  %vm928_vm5 = vcmp.ge.f32.partialorder %v806_v12, 0.0 }
 0x149   : > { %vm927_vm6 = vcmp.ge.f32.partialorder %v801_v14, 0.0  ;;  %v991_v18 = vmul.f32 0.1, %v801_v14  ;;  %v2328_v19 = vpop.f32.mrb[50].mxu0  ;;  %2425 = vmatmul.mubr.msk.f32.gmra.mrb[46].mxu1 %vm1082_vm3, %v1054_v17 }
 0x14a   : > { %v816_v20 = vadd.f32 %v2328_v19, %v2676_v9  ;;  %v810_v21 = vpop.f32.mrb[51].mxu0  ;;  %v1056_v25 = vsel %vm928_vm5, %v806_v12, %v992_v16 }
 0x14b   : > { %v811_v22 = vadd.f32 %v2676_v9, %v810_v21  ;;  %v1055_v23 = vsel %vm927_vm6, %v801_v14, %v991_v18 }
 0x14c   : > { %v994_v24 = vmul.f32 0.1, %v816_v20  ;;  %2427 = vmatprep.mubr.msk.f32.mxu1 %vm1082_vm3, %v1055_v23  ;;  %vm930_vm7 = vcmp.ge.f32.partialorder %v816_v20, 0.0 }
 0x14d   : > { %vm929_vm8 = vcmp.ge.f32.partialorder %v811_v22, 0.0  ;;  %v993_v26 = vmul.f32 0.1, %v811_v22  ;;  %v2331_v27 = vpop.f32.mrb[52].mxu0  ;;  %2428 = vmatmul.mubr.msk.f32.gmra.mrb[48].mxu1 %vm1082_vm3, %v1056_v25 }
 0x14e   : > { %v826_v28 = vadd.f32 %v2331_v27, %v2676_v9  ;;  %v820_v29 = vpop.f32.mrb[53].mxu0  ;;  %v1058_v33 = vsel %vm930_vm7, %v816_v20, %v994_v24 }
 0x14f   : > { %v821_v30 = vadd.f32 %v2676_v9, %v820_v29  ;;  %v1057_v31 = vsel %vm929_vm8, %v811_v22, %v993_v26 }
 0x150   : > { %v996_v32 = vmul.f32 0.1, %v826_v28  ;;  %2430 = vmatprep.mubr.msk.f32.mxu1 %vm1082_vm3, %v1057_v31  ;;  %vm932_vm9 = vcmp.ge.f32.partialorder %v826_v28, 0.0 }
 0x151   : > { %vm931_vm10 = vcmp.ge.f32.partialorder %v821_v30, 0.0  ;;  %v995_v34 = vmul.f32 0.1, %v821_v30  ;;  %v2334_v35 = vpop.f32.mrb[54].mxu0  ;;  %2431 = vmatmul.mubr.msk.f32.gmra.mrb[50].mxu1 %vm1082_vm3, %v1058_v33 }
 0x152   : > { %v836_v36 = vadd.f32 %v2334_v35, %v2676_v9  ;;  %v830_v37 = vpop.f32.mrb[55].mxu0  ;;  %v1060_v41 = vsel %vm932_vm9, %v826_v28, %v996_v32 }
 0x153   : > { %v831_v38 = vadd.f32 %v2676_v9, %v830_v37  ;;  %v1059_v39 = vsel %vm931_vm10, %v821_v30, %v995_v34 }
 0x154   : > { %v998_v40 = vmul.f32 0.1, %v836_v36  ;;  %2433 = vmatprep.mubr.msk.f32.mxu1 %vm1082_vm3, %v1059_v39  ;;  %vm934_vm11 = vcmp.ge.f32.partialorder %v836_v36, 0.0 }
 0x155   : > { %vm933_vm12 = vcmp.ge.f32.partialorder %v831_v38, 0.0  ;;  %v997_v42 = vmul.f32 0.1, %v831_v38  ;;  %v2337_v43 = vpop.f32.mrb[56].mxu0  ;;  %2434 = vmatmul.mubr.msk.f32.gmra.mrb[52].mxu1 %vm1082_vm3, %v1060_v41 }
 0x156   : > { %v846_v44 = vadd.f32 %v2337_v43, %v2676_v9  ;;  %v840_v45 = vpop.f32.mrb[57].mxu0  ;;  %v1062_v49 = vsel %vm934_vm11, %v836_v36, %v998_v40 }
 0x157   : > { %v841_v46 = vadd.f32 %v2676_v9, %v840_v45  ;;  %v1061_v47 = vsel %vm933_vm12, %v831_v38, %v997_v42 }
 0x158   : > { %v1000_v48 = vmul.f32 0.1, %v846_v44  ;;  %2436 = vmatprep.mubr.msk.f32.mxu1 %vm1082_vm3, %v1061_v47  ;;  %vm936_vm13 = vcmp.ge.f32.partialorder %v846_v44, 0.0 }
 0x159   : > { %vm935_vm14 = vcmp.ge.f32.partialorder %v841_v46, 0.0  ;;  %v999_v50 = vmul.f32 0.1, %v841_v46  ;;  %v2340_v51 = vpop.f32.mrb[58].mxu0  ;;  %2437 = vmatmul.mubr.msk.f32.gmra.mrb[54].mxu1 %vm1082_vm3, %v1062_v49 }
 0x15a   : > { %v856_v52 = vadd.f32 %v2340_v51, %v2676_v9  ;;  %v850_v53 = vpop.f32.mrb[59].mxu0  ;;  %v1064_v57 = vsel %vm936_vm13, %v846_v44, %v1000_v48 }
 0x15b   : > { %v851_v54 = vadd.f32 %v2676_v9, %v850_v53  ;;  %v1063_v55 = vsel %vm935_vm14, %v841_v46, %v999_v50 }
 0x15c   : > { %v1002_v56 = vmul.f32 0.1, %v856_v52  ;;  %2439 = vmatprep.mubr.msk.f32.mxu1 %vm1082_vm3, %v1063_v55  ;;  %vm938_vm15 = vcmp.ge.f32.partialorder %v856_v52, 0.0 }
 0x15d   : > { %vm937_vm0 = vcmp.ge.f32.partialorder %v851_v54, 0.0  ;;  %v1001_v58 = vmul.f32 0.1, %v851_v54  ;;  %v2343_v59 = vpop.f32.mrb[60].mxu0  ;;  %2440 = vmatmul.mubr.msk.f32.gmra.mrb[56].mxu1 %vm1082_vm3, %v1064_v57 }
 0x15e   : > { %v866_v60 = vadd.f32 %v2343_v59, %v2676_v9  ;;  %v860_v61 = vpop.f32.mrb[61].mxu0  ;;  %v1066_v1 = vsel %vm938_vm15, %v856_v52, %v1002_v56 }
 0x15f   : > { %v861_v62 = vadd.f32 %v2676_v9, %v860_v61  ;;  %v1065_v63 = vsel %vm937_vm0, %v851_v54, %v1001_v58 }
 0x160   : > { %v1004_v0 = vmul.f32 0.1, %v866_v60  ;;  %2442 = vmatprep.mubr.msk.f32.mxu1 %vm1082_vm3, %v1065_v63  ;;  %vm940_vm1 = vcmp.ge.f32.partialorder %v866_v60, 0.0 }
 0x161   : > { %vm939_vm2 = vcmp.ge.f32.partialorder %v861_v62, 0.0  ;;  %v1003_v2 = vmul.f32 0.1, %v861_v62  ;;  %v2346_v3 = vpop.f32.mrb[62].mxu0  ;;  %2443 = vmatmul.mubr.msk.f32.gmra.mrb[58].mxu1 %vm1082_vm3, %v1066_v1 }
 0x162   : > { %v876_v4 = vadd.f32 %v2346_v3, %v2676_v9  ;;  %v870_v5 = vpop.f32.mrb[63].mxu0  ;;  %v1068_v10 = vsel %vm940_vm1, %v866_v60, %v1004_v0 }
 0x163   : > { %v871_v6 = vadd.f32 %v2676_v9, %v870_v5  ;;  %v1067_v7 = vsel %vm939_vm2, %v861_v62, %v1003_v2  ;;  %v2809_v9 = vld [vmem:[%s2953_s4] ss:$0 sm:$0xff] }
 0x164   : > { %v1006_v8 = vmul.f32 0.1, %v876_v4  ;;  %2445 = vmatprep.mubr.msk.f32.mxu1 %vm1082_vm3, %v1067_v7  ;;  %vm942_vm4 = vcmp.ge.f32.partialorder %v876_v4, 0.0 }
 0x165   : > { %vm941_vm5 = vcmp.ge.f32.partialorder %v871_v6, 0.0  ;;  %v1005_v11 = vmul.f32 0.1, %v871_v6  ;;  %2446 = vmatmul.mubr.msk.f32.gmra.mrb[60].mxu1 %vm1082_vm3, %v1068_v10 }
 0x166   : > { %v1070_v13 = vsel %vm942_vm4, %v876_v4, %v1006_v8 }
 0x167   : > { %v1069_v12 = vsel %vm941_vm5, %v871_v6, %v1005_v11 }
 0x168   : > { %2448 = vmatprep.mubr.msk.f32.mxu1 %vm1082_vm3, %v1069_v12 }
 0x169   : > { %2449 = vmatmul.mubr.msk.f32.gmra.mrb[62].mxu1 %vm1082_vm3, %v1070_v13 }
 0x1c0   : > { %v2357_v14 = vpop.f32.mrb[0].mxu1 }
 0x1c1   : > { %v1347_v15 = vadd.f32 %v2357_v14, %v2809_v9  ;;  %v1341_v16 = vpop.f32.mrb[1].mxu1 }
 0x1c2   : > { %v1342_v17 = vadd.f32 %v2809_v9, %v1341_v16 }
 0x1c3   : > { %vm1661_vm3 = vcmp.ge.f32.partialorder %v1347_v15, 0.0  ;;  %v1725_v18 = vmul.f32 0.1, %v1347_v15 }
 0x1c4   : > { %vm1660_vm6 = vcmp.ge.f32.partialorder %v1342_v17, 0.0  ;;  %v1724_v19 = vmul.f32 0.1, %v1342_v17  ;;  %v2360_v20 = vpop.f32.mrb[2].mxu1 }
 0x1c5   : > { %v1789_v21 = vsel %vm1661_vm3, %v1347_v15, %v1725_v18  ;;  %v1357_v22 = vadd.f32 %v2360_v20, %v2809_v9  ;;  %v1351_v23 = vpop.f32.mrb[3].mxu1 }
 0x1c6   : > { %1853 = vst [vmem:[%s2818_s19 + $0x8] sm:$0xff] %v1789_v21  ;;  %v1788_v24 = vsel %vm1660_vm6, %v1342_v17, %v1724_v19  ;;  %v1352_v25 = vadd.f32 %v2809_v9, %v1351_v23 }
 0x1c7   : > { %1852 = vst [vmem:[%s2818_s19] sm:$0xff] %v1788_v24  ;;  %vm1663_vm7 = vcmp.ge.f32.partialorder %v1357_v22, 0.0  ;;  %v1727_v26 = vmul.f32 0.1, %v1357_v22 }
 0x1c8   : > { %vm1662_vm8 = vcmp.ge.f32.partialorder %v1352_v25, 0.0  ;;  %v1726_v27 = vmul.f32 0.1, %v1352_v25  ;;  %v2363_v28 = vpop.f32.mrb[4].mxu1 }
 0x1c9   : > { %v1791_v29 = vsel %vm1663_vm7, %v1357_v22, %v1727_v26  ;;  %v1367_v30 = vadd.f32 %v2363_v28, %v2809_v9  ;;  %v1361_v31 = vpop.f32.mrb[5].mxu1 }
 0x1ca   : > { %1855 = vst [vmem:[%s2818_s19 + $0x18] sm:$0xff] %v1791_v29  ;;  %v1790_v32 = vsel %vm1662_vm8, %v1352_v25, %v1726_v27  ;;  %v1362_v33 = vadd.f32 %v2809_v9, %v1361_v31 }
 0x1cb   : > { %1854 = vst [vmem:[%s2818_s19 + $0x10] sm:$0xff] %v1790_v32  ;;  %vm1665_vm9 = vcmp.ge.f32.partialorder %v1367_v30, 0.0  ;;  %v1729_v34 = vmul.f32 0.1, %v1367_v30 }
 0x1cc   : > { %vm1664_vm10 = vcmp.ge.f32.partialorder %v1362_v33, 0.0  ;;  %v1728_v35 = vmul.f32 0.1, %v1362_v33  ;;  %v2366_v36 = vpop.f32.mrb[6].mxu1 }
 0x1cd   : > { %v1793_v37 = vsel %vm1665_vm9, %v1367_v30, %v1729_v34  ;;  %v1377_v38 = vadd.f32 %v2366_v36, %v2809_v9  ;;  %v1371_v39 = vpop.f32.mrb[7].mxu1 }
 0x1ce   : > { %1857 = vst [vmem:[%s2818_s19 + $0x28] sm:$0xff] %v1793_v37  ;;  %v1792_v40 = vsel %vm1664_vm10, %v1362_v33, %v1728_v35  ;;  %v1372_v41 = vadd.f32 %v2809_v9, %v1371_v39 }
 0x1cf   : > { %1856 = vst [vmem:[%s2818_s19 + $0x20] sm:$0xff] %v1792_v40  ;;  %vm1667_vm11 = vcmp.ge.f32.partialorder %v1377_v38, 0.0  ;;  %v1731_v42 = vmul.f32 0.1, %v1377_v38 }
 0x1d0   : > { %vm1666_vm12 = vcmp.ge.f32.partialorder %v1372_v41, 0.0  ;;  %v1730_v43 = vmul.f32 0.1, %v1372_v41  ;;  %v2369_v44 = vpop.f32.mrb[8].mxu1 }
 0x1d1   : > { %v1795_v45 = vsel %vm1667_vm11, %v1377_v38, %v1731_v42  ;;  %v1387_v46 = vadd.f32 %v2369_v44, %v2809_v9  ;;  %v1381_v47 = vpop.f32.mrb[9].mxu1 }
 0x1d2   : > { %1859 = vst [vmem:[%s2818_s19 + $0x38] sm:$0xff] %v1795_v45  ;;  %v1794_v48 = vsel %vm1666_vm12, %v1372_v41, %v1730_v43  ;;  %v1382_v49 = vadd.f32 %v2809_v9, %v1381_v47 }
 0x1d3   : > { %1858 = vst [vmem:[%s2818_s19 + $0x30] sm:$0xff] %v1794_v48  ;;  %vm1669_vm13 = vcmp.ge.f32.partialorder %v1387_v46, 0.0  ;;  %v1733_v50 = vmul.f32 0.1, %v1387_v46 }
 0x1d4   : > { %vm1668_vm14 = vcmp.ge.f32.partialorder %v1382_v49, 0.0  ;;  %v1732_v51 = vmul.f32 0.1, %v1382_v49  ;;  %v2372_v52 = vpop.f32.mrb[10].mxu1 }
 0x1d5   : > { %v1797_v53 = vsel %vm1669_vm13, %v1387_v46, %v1733_v50  ;;  %v1397_v54 = vadd.f32 %v2372_v52, %v2809_v9  ;;  %v1391_v55 = vpop.f32.mrb[11].mxu1 }
 0x1d6   : > { %1861 = vst [vmem:[%s2818_s19 + $0x48] sm:$0xff] %v1797_v53  ;;  %v1796_v56 = vsel %vm1668_vm14, %v1382_v49, %v1732_v51  ;;  %v1392_v57 = vadd.f32 %v2809_v9, %v1391_v55 }
 0x1d7   : > { %1860 = vst [vmem:[%s2818_s19 + $0x40] sm:$0xff] %v1796_v56  ;;  %vm1671_vm15 = vcmp.ge.f32.partialorder %v1397_v54, 0.0  ;;  %v1735_v58 = vmul.f32 0.1, %v1397_v54 }
 0x1d8   : > { %vm1670_vm0 = vcmp.ge.f32.partialorder %v1392_v57, 0.0  ;;  %v1734_v59 = vmul.f32 0.1, %v1392_v57  ;;  %v2375_v60 = vpop.f32.mrb[12].mxu1 }
 0x1d9   : > { %v1799_v61 = vsel %vm1671_vm15, %v1397_v54, %v1735_v58  ;;  %v1407_v62 = vadd.f32 %v2375_v60, %v2809_v9  ;;  %v1401_v63 = vpop.f32.mrb[13].mxu1 }
 0x1da   : > { %1863 = vst [vmem:[%s2818_s19 + $0x58] sm:$0xff] %v1799_v61  ;;  %v1798_v0 = vsel %vm1670_vm0, %v1392_v57, %v1734_v59  ;;  %v1402_v1 = vadd.f32 %v2809_v9, %v1401_v63 }
 0x1db   : > { %1862 = vst [vmem:[%s2818_s19 + $0x50] sm:$0xff] %v1798_v0  ;;  %vm1673_vm1 = vcmp.ge.f32.partialorder %v1407_v62, 0.0  ;;  %v1737_v2 = vmul.f32 0.1, %v1407_v62 }
 0x1dc   : > { %vm1672_vm2 = vcmp.ge.f32.partialorder %v1402_v1, 0.0  ;;  %v1736_v3 = vmul.f32 0.1, %v1402_v1  ;;  %v2378_v4 = vpop.f32.mrb[14].mxu1 }
 0x1dd   : > { %v1801_v5 = vsel %vm1673_vm1, %v1407_v62, %v1737_v2  ;;  %v1417_v6 = vadd.f32 %v2378_v4, %v2809_v9  ;;  %v1411_v7 = vpop.f32.mrb[15].mxu1 }
 0x1de   : > { %1865 = vst [vmem:[%s2818_s19 + $0x68] sm:$0xff] %v1801_v5  ;;  %v1800_v8 = vsel %vm1672_vm2, %v1402_v1, %v1736_v3  ;;  %v1412_v10 = vadd.f32 %v2809_v9, %v1411_v7 }
 0x1df   : > { %1864 = vst [vmem:[%s2818_s19 + $0x60] sm:$0xff] %v1800_v8  ;;  %vm1675_vm4 = vcmp.ge.f32.partialorder %v1417_v6, 0.0  ;;  %v1739_v11 = vmul.f32 0.1, %v1417_v6 }
 0x1e0   : > { %vm1674_vm5 = vcmp.ge.f32.partialorder %v1412_v10, 0.0  ;;  %v1738_v12 = vmul.f32 0.1, %v1412_v10  ;;  %v2381_v13 = vpop.f32.mrb[16].mxu1 }
 0x1e1   : > { %v1803_v14 = vsel %vm1675_vm4, %v1417_v6, %v1739_v11  ;;  %v1427_v15 = vadd.f32 %v2381_v13, %v2809_v9  ;;  %v1421_v16 = vpop.f32.mrb[17].mxu1 }
 0x1e2   : > { %1867 = vst [vmem:[%s2818_s19 + $0x78] sm:$0xff] %v1803_v14  ;;  %v1802_v17 = vsel %vm1674_vm5, %v1412_v10, %v1738_v12  ;;  %v1422_v18 = vadd.f32 %v2809_v9, %v1421_v16 }
 0x1e3   : > { %1866 = vst [vmem:[%s2818_s19 + $0x70] sm:$0xff] %v1802_v17  ;;  %vm1677_vm3 = vcmp.ge.f32.partialorder %v1427_v15, 0.0  ;;  %v1741_v19 = vmul.f32 0.1, %v1427_v15 }
 0x1e4   : > { %vm1676_vm6 = vcmp.ge.f32.partialorder %v1422_v18, 0.0  ;;  %v1740_v20 = vmul.f32 0.1, %v1422_v18  ;;  %v2384_v21 = vpop.f32.mrb[18].mxu1 }
 0x1e5   : > { %v1805_v22 = vsel %vm1677_vm3, %v1427_v15, %v1741_v19  ;;  %v1437_v23 = vadd.f32 %v2384_v21, %v2809_v9  ;;  %v1431_v24 = vpop.f32.mrb[19].mxu1 }
 0x1e6   : > { %1869 = vst [vmem:[%s2818_s19 + $0x88] sm:$0xff] %v1805_v22  ;;  %v1804_v25 = vsel %vm1676_vm6, %v1422_v18, %v1740_v20  ;;  %v1432_v26 = vadd.f32 %v2809_v9, %v1431_v24 }
 0x1e7   : > { %1868 = vst [vmem:[%s2818_s19 + $0x80] sm:$0xff] %v1804_v25  ;;  %vm1679_vm7 = vcmp.ge.f32.partialorder %v1437_v23, 0.0  ;;  %v1743_v27 = vmul.f32 0.1, %v1437_v23 }
 0x1e8   : > { %vm1678_vm8 = vcmp.ge.f32.partialorder %v1432_v26, 0.0  ;;  %v1742_v28 = vmul.f32 0.1, %v1432_v26  ;;  %v2387_v29 = vpop.f32.mrb[20].mxu1 }
 0x1e9   : > { %v1807_v30 = vsel %vm1679_vm7, %v1437_v23, %v1743_v27  ;;  %v1447_v31 = vadd.f32 %v2387_v29, %v2809_v9  ;;  %v1441_v32 = vpop.f32.mrb[21].mxu1 }
 0x1ea   : > { %1871 = vst [vmem:[%s2818_s19 + $0x98] sm:$0xff] %v1807_v30  ;;  %v1806_v33 = vsel %vm1678_vm8, %v1432_v26, %v1742_v28  ;;  %v1442_v34 = vadd.f32 %v2809_v9, %v1441_v32 }
 0x1eb   : > { %1870 = vst [vmem:[%s2818_s19 + $0x90] sm:$0xff] %v1806_v33  ;;  %vm1681_vm9 = vcmp.ge.f32.partialorder %v1447_v31, 0.0  ;;  %v1745_v35 = vmul.f32 0.1, %v1447_v31 }
 0x1ec   : > { %vm1680_vm10 = vcmp.ge.f32.partialorder %v1442_v34, 0.0  ;;  %v1744_v36 = vmul.f32 0.1, %v1442_v34  ;;  %v2390_v37 = vpop.f32.mrb[22].mxu1 }
 0x1ed   : > { %v1809_v38 = vsel %vm1681_vm9, %v1447_v31, %v1745_v35  ;;  %v1457_v39 = vadd.f32 %v2390_v37, %v2809_v9  ;;  %v1451_v40 = vpop.f32.mrb[23].mxu1 }
 0x1ee   : > { %1873 = vst [vmem:[%s2818_s19 + $0xa8] sm:$0xff] %v1809_v38  ;;  %v1808_v41 = vsel %vm1680_vm10, %v1442_v34, %v1744_v36  ;;  %v1452_v42 = vadd.f32 %v2809_v9, %v1451_v40 }
 0x1ef   : > { %1872 = vst [vmem:[%s2818_s19 + $0xa0] sm:$0xff] %v1808_v41  ;;  %vm1683_vm11 = vcmp.ge.f32.partialorder %v1457_v39, 0.0  ;;  %v1747_v43 = vmul.f32 0.1, %v1457_v39 }
 0x1f0   : > { %vm1682_vm12 = vcmp.ge.f32.partialorder %v1452_v42, 0.0  ;;  %v1746_v44 = vmul.f32 0.1, %v1452_v42  ;;  %v2393_v45 = vpop.f32.mrb[24].mxu1 }
 0x1f1   : > { %v1811_v46 = vsel %vm1683_vm11, %v1457_v39, %v1747_v43  ;;  %v1467_v47 = vadd.f32 %v2393_v45, %v2809_v9  ;;  %v1461_v48 = vpop.f32.mrb[25].mxu1 }
 0x1f2   : > { %1875 = vst [vmem:[%s2818_s19 + $0xb8] sm:$0xff] %v1811_v46  ;;  %v1810_v49 = vsel %vm1682_vm12, %v1452_v42, %v1746_v44  ;;  %v1462_v50 = vadd.f32 %v2809_v9, %v1461_v48 }
 0x1f3   : > { %1874 = vst [vmem:[%s2818_s19 + $0xb0] sm:$0xff] %v1810_v49  ;;  %vm1685_vm13 = vcmp.ge.f32.partialorder %v1467_v47, 0.0  ;;  %v1749_v51 = vmul.f32 0.1, %v1467_v47 }
 0x1f4   : > { %vm1684_vm14 = vcmp.ge.f32.partialorder %v1462_v50, 0.0  ;;  %v1748_v52 = vmul.f32 0.1, %v1462_v50  ;;  %v2396_v53 = vpop.f32.mrb[26].mxu1 }
 0x1f5   : > { %v1813_v54 = vsel %vm1685_vm13, %v1467_v47, %v1749_v51  ;;  %v1477_v55 = vadd.f32 %v2396_v53, %v2809_v9  ;;  %v1471_v56 = vpop.f32.mrb[27].mxu1 }
 0x1f6   : > { %1877 = vst [vmem:[%s2818_s19 + $0xc8] sm:$0xff] %v1813_v54  ;;  %v1812_v57 = vsel %vm1684_vm14, %v1462_v50, %v1748_v52  ;;  %v1472_v58 = vadd.f32 %v2809_v9, %v1471_v56 }
 0x1f7   : > { %1876 = vst [vmem:[%s2818_s19 + $0xc0] sm:$0xff] %v1812_v57  ;;  %vm1687_vm15 = vcmp.ge.f32.partialorder %v1477_v55, 0.0  ;;  %v1751_v59 = vmul.f32 0.1, %v1477_v55 }
 0x1f8   : > { %vm1686_vm0 = vcmp.ge.f32.partialorder %v1472_v58, 0.0  ;;  %v1750_v60 = vmul.f32 0.1, %v1472_v58  ;;  %v2399_v61 = vpop.f32.mrb[28].mxu1 }
 0x1f9   : > { %v1815_v62 = vsel %vm1687_vm15, %v1477_v55, %v1751_v59  ;;  %v1487_v63 = vadd.f32 %v2399_v61, %v2809_v9  ;;  %v1481_v0 = vpop.f32.mrb[29].mxu1 }
 0x1fa   : > { %1879 = vst [vmem:[%s2818_s19 + $0xd8] sm:$0xff] %v1815_v62  ;;  %v1814_v1 = vsel %vm1686_vm0, %v1472_v58, %v1750_v60  ;;  %v1482_v2 = vadd.f32 %v2809_v9, %v1481_v0 }
 0x1fb   : > { %1878 = vst [vmem:[%s2818_s19 + $0xd0] sm:$0xff] %v1814_v1  ;;  %vm1689_vm1 = vcmp.ge.f32.partialorder %v1487_v63, 0.0  ;;  %v1753_v3 = vmul.f32 0.1, %v1487_v63 }
 0x1fc   : > { %vm1688_vm2 = vcmp.ge.f32.partialorder %v1482_v2, 0.0  ;;  %v1752_v4 = vmul.f32 0.1, %v1482_v2  ;;  %v2402_v5 = vpop.f32.mrb[30].mxu1 }
 0x1fd   : > { %v1817_v6 = vsel %vm1689_vm1, %v1487_v63, %v1753_v3  ;;  %v1497_v7 = vadd.f32 %v2402_v5, %v2809_v9  ;;  %v1491_v8 = vpop.f32.mrb[31].mxu1 }
 0x1fe   : > { %1881 = vst [vmem:[%s2818_s19 + $0xe8] sm:$0xff] %v1817_v6  ;;  %v1816_v10 = vsel %vm1688_vm2, %v1482_v2, %v1752_v4  ;;  %v1492_v11 = vadd.f32 %v2809_v9, %v1491_v8 }
 0x1ff   : > { %1880 = vst [vmem:[%s2818_s19 + $0xe0] sm:$0xff] %v1816_v10  ;;  %vm1691_vm4 = vcmp.ge.f32.partialorder %v1497_v7, 0.0  ;;  %v1755_v12 = vmul.f32 0.1, %v1497_v7 }
 0x200   : > { %vm1690_vm5 = vcmp.ge.f32.partialorder %v1492_v11, 0.0  ;;  %v1754_v13 = vmul.f32 0.1, %v1492_v11  ;;  %v2405_v14 = vpop.f32.mrb[32].mxu1 }
 0x201   : > { %v1819_v15 = vsel %vm1691_vm4, %v1497_v7, %v1755_v12  ;;  %v1507_v16 = vadd.f32 %v2405_v14, %v2809_v9  ;;  %v1501_v17 = vpop.f32.mrb[33].mxu1 }
 0x202   : > { %1883 = vst [vmem:[%s2818_s19 + $0xf8] sm:$0xff] %v1819_v15  ;;  %v1818_v18 = vsel %vm1690_vm5, %v1492_v11, %v1754_v13  ;;  %v1502_v19 = vadd.f32 %v2809_v9, %v1501_v17 }
 0x203   : > { %1882 = vst [vmem:[%s2818_s19 + $0xf0] sm:$0xff] %v1818_v18  ;;  %vm1693_vm3 = vcmp.ge.f32.partialorder %v1507_v16, 0.0  ;;  %v1757_v20 = vmul.f32 0.1, %v1507_v16 }
 0x204   : > { %vm1692_vm6 = vcmp.ge.f32.partialorder %v1502_v19, 0.0  ;;  %v1756_v21 = vmul.f32 0.1, %v1502_v19  ;;  %v2408_v22 = vpop.f32.mrb[34].mxu1 }
 0x205   : > { %v1821_v23 = vsel %vm1693_vm3, %v1507_v16, %v1757_v20  ;;  %v1517_v24 = vadd.f32 %v2408_v22, %v2809_v9  ;;  %v1511_v25 = vpop.f32.mrb[35].mxu1 }
 0x206   : > { %1885 = vst [vmem:[%s2818_s19 + $0x108] sm:$0xff] %v1821_v23  ;;  %v1820_v26 = vsel %vm1692_vm6, %v1502_v19, %v1756_v21  ;;  %v1512_v27 = vadd.f32 %v2809_v9, %v1511_v25 }
 0x207   : > { %1884 = vst [vmem:[%s2818_s19 + $0x100] sm:$0xff] %v1820_v26  ;;  %vm1695_vm7 = vcmp.ge.f32.partialorder %v1517_v24, 0.0  ;;  %v1759_v28 = vmul.f32 0.1, %v1517_v24 }
 0x208   : > { %vm1694_vm8 = vcmp.ge.f32.partialorder %v1512_v27, 0.0  ;;  %v1758_v29 = vmul.f32 0.1, %v1512_v27  ;;  %v2411_v30 = vpop.f32.mrb[36].mxu1 }
 0x209   : > { %v1823_v31 = vsel %vm1695_vm7, %v1517_v24, %v1759_v28  ;;  %v1527_v32 = vadd.f32 %v2411_v30, %v2809_v9  ;;  %v1521_v33 = vpop.f32.mrb[37].mxu1 }
 0x20a   : > { %1887 = vst [vmem:[%s2818_s19 + $0x118] sm:$0xff] %v1823_v31  ;;  %v1822_v34 = vsel %vm1694_vm8, %v1512_v27, %v1758_v29  ;;  %v1522_v35 = vadd.f32 %v2809_v9, %v1521_v33 }
 0x20b   : > { %1886 = vst [vmem:[%s2818_s19 + $0x110] sm:$0xff] %v1822_v34  ;;  %vm1697_vm9 = vcmp.ge.f32.partialorder %v1527_v32, 0.0  ;;  %v1761_v36 = vmul.f32 0.1, %v1527_v32 }
 0x20c   : > { %vm1696_vm10 = vcmp.ge.f32.partialorder %v1522_v35, 0.0  ;;  %v1760_v37 = vmul.f32 0.1, %v1522_v35  ;;  %v2414_v38 = vpop.f32.mrb[38].mxu1 }
 0x20d   : > { %v1825_v39 = vsel %vm1697_vm9, %v1527_v32, %v1761_v36  ;;  %v1537_v40 = vadd.f32 %v2414_v38, %v2809_v9  ;;  %v1531_v41 = vpop.f32.mrb[39].mxu1 }
 0x20e   : > { %1889 = vst [vmem:[%s2818_s19 + $0x128] sm:$0xff] %v1825_v39  ;;  %v1824_v42 = vsel %vm1696_vm10, %v1522_v35, %v1760_v37  ;;  %v1532_v43 = vadd.f32 %v2809_v9, %v1531_v41 }
 0x20f   : > { %1888 = vst [vmem:[%s2818_s19 + $0x120] sm:$0xff] %v1824_v42  ;;  %vm1699_vm11 = vcmp.ge.f32.partialorder %v1537_v40, 0.0  ;;  %v1763_v44 = vmul.f32 0.1, %v1537_v40 }
 0x210   : > { %vm1698_vm12 = vcmp.ge.f32.partialorder %v1532_v43, 0.0  ;;  %v1762_v45 = vmul.f32 0.1, %v1532_v43  ;;  %v2417_v46 = vpop.f32.mrb[40].mxu1 }
 0x211   : > { %v1827_v47 = vsel %vm1699_vm11, %v1537_v40, %v1763_v44  ;;  %v1547_v48 = vadd.f32 %v2417_v46, %v2809_v9  ;;  %v1541_v49 = vpop.f32.mrb[41].mxu1 }
 0x212   : > { %1891 = vst [vmem:[%s2818_s19 + $0x138] sm:$0xff] %v1827_v47  ;;  %v1826_v50 = vsel %vm1698_vm12, %v1532_v43, %v1762_v45  ;;  %v1542_v51 = vadd.f32 %v2809_v9, %v1541_v49 }
 0x213   : > { %1890 = vst [vmem:[%s2818_s19 + $0x130] sm:$0xff] %v1826_v50  ;;  %vm1701_vm13 = vcmp.ge.f32.partialorder %v1547_v48, 0.0  ;;  %v1765_v52 = vmul.f32 0.1, %v1547_v48 }
 0x214   : > { %vm1700_vm14 = vcmp.ge.f32.partialorder %v1542_v51, 0.0  ;;  %v1764_v53 = vmul.f32 0.1, %v1542_v51  ;;  %v2420_v54 = vpop.f32.mrb[42].mxu1 }
 0x215   : > { %v1829_v55 = vsel %vm1701_vm13, %v1547_v48, %v1765_v52  ;;  %v1557_v56 = vadd.f32 %v2420_v54, %v2809_v9  ;;  %v1551_v57 = vpop.f32.mrb[43].mxu1 }
 0x216   : > { %1893 = vst [vmem:[%s2818_s19 + $0x148] sm:$0xff] %v1829_v55  ;;  %v1828_v58 = vsel %vm1700_vm14, %v1542_v51, %v1764_v53  ;;  %v1552_v59 = vadd.f32 %v2809_v9, %v1551_v57 }
 0x217   : > { %1892 = vst [vmem:[%s2818_s19 + $0x140] sm:$0xff] %v1828_v58  ;;  %vm1703_vm15 = vcmp.ge.f32.partialorder %v1557_v56, 0.0  ;;  %v1767_v60 = vmul.f32 0.1, %v1557_v56 }
 0x218   : > { %vm1702_vm0 = vcmp.ge.f32.partialorder %v1552_v59, 0.0  ;;  %v1766_v61 = vmul.f32 0.1, %v1552_v59  ;;  %v2423_v62 = vpop.f32.mrb[44].mxu1 }
 0x219   : > { %v1831_v63 = vsel %vm1703_vm15, %v1557_v56, %v1767_v60  ;;  %v1567_v0 = vadd.f32 %v2423_v62, %v2809_v9  ;;  %v1561_v1 = vpop.f32.mrb[45].mxu1 }
 0x21a   : > { %1895 = vst [vmem:[%s2818_s19 + $0x158] sm:$0xff] %v1831_v63  ;;  %v1830_v2 = vsel %vm1702_vm0, %v1552_v59, %v1766_v61  ;;  %v1562_v3 = vadd.f32 %v2809_v9, %v1561_v1 }
 0x21b   : > { %1894 = vst [vmem:[%s2818_s19 + $0x150] sm:$0xff] %v1830_v2  ;;  %vm1705_vm1 = vcmp.ge.f32.partialorder %v1567_v0, 0.0  ;;  %v1769_v4 = vmul.f32 0.1, %v1567_v0 }
 0x21c   : > { %vm1704_vm2 = vcmp.ge.f32.partialorder %v1562_v3, 0.0  ;;  %v1768_v5 = vmul.f32 0.1, %v1562_v3  ;;  %v2426_v6 = vpop.f32.mrb[46].mxu1 }
 0x21d   : > { %v1833_v7 = vsel %vm1705_vm1, %v1567_v0, %v1769_v4  ;;  %v1577_v8 = vadd.f32 %v2426_v6, %v2809_v9  ;;  %v1571_v10 = vpop.f32.mrb[47].mxu1 }
 0x21e   : > { %1897 = vst [vmem:[%s2818_s19 + $0x168] sm:$0xff] %v1833_v7  ;;  %v1832_v11 = vsel %vm1704_vm2, %v1562_v3, %v1768_v5  ;;  %v1572_v12 = vadd.f32 %v2809_v9, %v1571_v10 }
 0x21f   : > { %1896 = vst [vmem:[%s2818_s19 + $0x160] sm:$0xff] %v1832_v11  ;;  %vm1707_vm4 = vcmp.ge.f32.partialorder %v1577_v8, 0.0  ;;  %v1771_v13 = vmul.f32 0.1, %v1577_v8 }
 0x220   : > { %vm1706_vm5 = vcmp.ge.f32.partialorder %v1572_v12, 0.0  ;;  %v1770_v14 = vmul.f32 0.1, %v1572_v12  ;;  %v2429_v15 = vpop.f32.mrb[48].mxu1 }
 0x221   : > { %v1835_v16 = vsel %vm1707_vm4, %v1577_v8, %v1771_v13  ;;  %v1587_v17 = vadd.f32 %v2429_v15, %v2809_v9  ;;  %v1581_v18 = vpop.f32.mrb[49].mxu1 }
 0x222   : > { %1899 = vst [vmem:[%s2818_s19 + $0x178] sm:$0xff] %v1835_v16  ;;  %v1834_v19 = vsel %vm1706_vm5, %v1572_v12, %v1770_v14  ;;  %v1582_v20 = vadd.f32 %v2809_v9, %v1581_v18 }
 0x223   : > { %1898 = vst [vmem:[%s2818_s19 + $0x170] sm:$0xff] %v1834_v19  ;;  %vm1709_vm3 = vcmp.ge.f32.partialorder %v1587_v17, 0.0  ;;  %v1773_v21 = vmul.f32 0.1, %v1587_v17 }
 0x224   : > { %vm1708_vm6 = vcmp.ge.f32.partialorder %v1582_v20, 0.0  ;;  %v1772_v22 = vmul.f32 0.1, %v1582_v20  ;;  %v2432_v23 = vpop.f32.mrb[50].mxu1 }
 0x225   : > { %v1837_v24 = vsel %vm1709_vm3, %v1587_v17, %v1773_v21  ;;  %v1597_v25 = vadd.f32 %v2432_v23, %v2809_v9  ;;  %v1591_v26 = vpop.f32.mrb[51].mxu1 }
 0x226   : > { %1901 = vst [vmem:[%s2818_s19 + $0x188] sm:$0xff] %v1837_v24  ;;  %v1836_v27 = vsel %vm1708_vm6, %v1582_v20, %v1772_v22  ;;  %v1592_v28 = vadd.f32 %v2809_v9, %v1591_v26 }
 0x227   : > { %1900 = vst [vmem:[%s2818_s19 + $0x180] sm:$0xff] %v1836_v27  ;;  %vm1711_vm7 = vcmp.ge.f32.partialorder %v1597_v25, 0.0  ;;  %v1775_v29 = vmul.f32 0.1, %v1597_v25 }
 0x228   : > { %vm1710_vm8 = vcmp.ge.f32.partialorder %v1592_v28, 0.0  ;;  %v1774_v30 = vmul.f32 0.1, %v1592_v28  ;;  %v2435_v31 = vpop.f32.mrb[52].mxu1 }
 0x229   : > { %v1839_v32 = vsel %vm1711_vm7, %v1597_v25, %v1775_v29  ;;  %v1607_v33 = vadd.f32 %v2435_v31, %v2809_v9  ;;  %v1601_v34 = vpop.f32.mrb[53].mxu1 }
 0x22a   : > { %1903 = vst [vmem:[%s2818_s19 + $0x198] sm:$0xff] %v1839_v32  ;;  %v1838_v35 = vsel %vm1710_vm8, %v1592_v28, %v1774_v30  ;;  %v1602_v36 = vadd.f32 %v2809_v9, %v1601_v34 }
 0x22b   : > { %1902 = vst [vmem:[%s2818_s19 + $0x190] sm:$0xff] %v1838_v35  ;;  %vm1713_vm9 = vcmp.ge.f32.partialorder %v1607_v33, 0.0  ;;  %v1777_v37 = vmul.f32 0.1, %v1607_v33 }
 0x22c   : > { %vm1712_vm10 = vcmp.ge.f32.partialorder %v1602_v36, 0.0  ;;  %v1776_v38 = vmul.f32 0.1, %v1602_v36  ;;  %v2438_v39 = vpop.f32.mrb[54].mxu1 }
 0x22d   : > { %v1841_v40 = vsel %vm1713_vm9, %v1607_v33, %v1777_v37  ;;  %v1617_v41 = vadd.f32 %v2438_v39, %v2809_v9  ;;  %v1611_v42 = vpop.f32.mrb[55].mxu1 }
 0x22e   : > { %1905 = vst [vmem:[%s2818_s19 + $0x1a8] sm:$0xff] %v1841_v40  ;;  %v1840_v43 = vsel %vm1712_vm10, %v1602_v36, %v1776_v38  ;;  %v1612_v44 = vadd.f32 %v2809_v9, %v1611_v42 }
 0x22f   : > { %1904 = vst [vmem:[%s2818_s19 + $0x1a0] sm:$0xff] %v1840_v43  ;;  %vm1715_vm11 = vcmp.ge.f32.partialorder %v1617_v41, 0.0  ;;  %v1779_v45 = vmul.f32 0.1, %v1617_v41 }
 0x230   : > { %vm1714_vm12 = vcmp.ge.f32.partialorder %v1612_v44, 0.0  ;;  %v1778_v46 = vmul.f32 0.1, %v1612_v44  ;;  %v2441_v47 = vpop.f32.mrb[56].mxu1 }
 0x231   : > { %v1843_v48 = vsel %vm1715_vm11, %v1617_v41, %v1779_v45  ;;  %v1627_v49 = vadd.f32 %v2441_v47, %v2809_v9  ;;  %v1621_v50 = vpop.f32.mrb[57].mxu1 }
 0x232   : > { %1907 = vst [vmem:[%s2818_s19 + $0x1b8] sm:$0xff] %v1843_v48  ;;  %v1842_v51 = vsel %vm1714_vm12, %v1612_v44, %v1778_v46  ;;  %v1622_v52 = vadd.f32 %v2809_v9, %v1621_v50 }
 0x233   : > { %1906 = vst [vmem:[%s2818_s19 + $0x1b0] sm:$0xff] %v1842_v51  ;;  %vm1717_vm13 = vcmp.ge.f32.partialorder %v1627_v49, 0.0  ;;  %v1781_v53 = vmul.f32 0.1, %v1627_v49 }
 0x234   : > { %vm1716_vm14 = vcmp.ge.f32.partialorder %v1622_v52, 0.0  ;;  %v1780_v54 = vmul.f32 0.1, %v1622_v52  ;;  %v2444_v55 = vpop.f32.mrb[58].mxu1 }
 0x235   : > { %v1845_v56 = vsel %vm1717_vm13, %v1627_v49, %v1781_v53  ;;  %v1637_v57 = vadd.f32 %v2444_v55, %v2809_v9  ;;  %v1631_v58 = vpop.f32.mrb[59].mxu1 }
 0x236   : > { %1909 = vst [vmem:[%s2818_s19 + $0x1c8] sm:$0xff] %v1845_v56  ;;  %v1844_v59 = vsel %vm1716_vm14, %v1622_v52, %v1780_v54  ;;  %v1632_v60 = vadd.f32 %v2809_v9, %v1631_v58 }
 0x237   : > { %1908 = vst [vmem:[%s2818_s19 + $0x1c0] sm:$0xff] %v1844_v59  ;;  %vm1719_vm15 = vcmp.ge.f32.partialorder %v1637_v57, 0.0  ;;  %v1783_v61 = vmul.f32 0.1, %v1637_v57 }
 0x238   : > { %vm1718_vm0 = vcmp.ge.f32.partialorder %v1632_v60, 0.0  ;;  %v1782_v62 = vmul.f32 0.1, %v1632_v60  ;;  %v2447_v63 = vpop.f32.mrb[60].mxu1 }
 0x239   : > { %v1847_v0 = vsel %vm1719_vm15, %v1637_v57, %v1783_v61  ;;  %v1647_v1 = vadd.f32 %v2447_v63, %v2809_v9  ;;  %v1641_v2 = vpop.f32.mrb[61].mxu1 }
 0x23a   : > { %1911 = vst [vmem:[%s2818_s19 + $0x1d8] sm:$0xff] %v1847_v0  ;;  %v1846_v3 = vsel %vm1718_vm0, %v1632_v60, %v1782_v62  ;;  %v1642_v4 = vadd.f32 %v2809_v9, %v1641_v2 }
 0x23b   : > { %1910 = vst [vmem:[%s2818_s19 + $0x1d0] sm:$0xff] %v1846_v3  ;;  %vm1721_vm1 = vcmp.ge.f32.partialorder %v1647_v1, 0.0  ;;  %v1785_v5 = vmul.f32 0.1, %v1647_v1 }
 0x23c   : > { %vm1720_vm2 = vcmp.ge.f32.partialorder %v1642_v4, 0.0  ;;  %v1784_v6 = vmul.f32 0.1, %v1642_v4  ;;  %v2450_v7 = vpop.f32.mrb[62].mxu1 }
 0x23d   : > { %v1849_v8 = vsel %vm1721_vm1, %v1647_v1, %v1785_v5  ;;  %v1657_v10 = vadd.f32 %v2450_v7, %v2809_v9  ;;  %v1651_v11 = vpop.f32.mrb[63].mxu1 }
 0x23e   : > { %1913 = vst [vmem:[%s2818_s19 + $0x1e8] sm:$0xff] %v1849_v8  ;;  %v1848_v12 = vsel %vm1720_vm2, %v1642_v4, %v1784_v6  ;;  %v1652_v13 = vadd.f32 %v2809_v9, %v1651_v11 }
 0x23f   : > { %1912 = vst [vmem:[%s2818_s19 + $0x1e0] sm:$0xff] %v1848_v12  ;;  %vm1723_vm4 = vcmp.ge.f32.partialorder %v1657_v10, 0.0  ;;  %v1787_v14 = vmul.f32 0.1, %v1657_v10 }
 0x240   : > { %vm1722_vm5 = vcmp.ge.f32.partialorder %v1652_v13, 0.0  ;;  %v1786_v15 = vmul.f32 0.1, %v1652_v13 }
 0x241   : > { %v1851_v16 = vsel %vm1723_vm4, %v1657_v10, %v1787_v14 }
 0x242   : > { %1915 = vst [vmem:[%s2818_s19 + $0x1f8] sm:$0xff] %v1851_v16  ;;  %v1850_v17 = vsel %vm1722_vm5, %v1652_v13, %v1786_v15 }
 0x243   : > { %1914 = vst [vmem:[%s2818_s19 + $0x1f0] sm:$0xff] %v1850_v17 }
 0x244 PF: > { %s15_s18 = sadd.s32 1, %s2477_s18  }
 0x245   : > { %p12_p4 = scmp.ge.s32.totalorder %s15_s18, 4  }
 0x247   :  { %14 = sbr.rel (!%p12_p4) target bundleno = 1 (0x1), region = 70 }

</bundles_post_ra>
